<compile_context>
chip_gen: v5e
topology: v5e:2x2
jax: 0.10.0
libtpu: 0.0.40
codegen_flags: <defaults>
</compile_context>

<pallas_src>
import functools
import math

import jax
import jax.numpy as jnp
from jax import lax
from jax.experimental import pallas as pl
from jax.experimental.pallas import tpu as pltpu


def _round_up(x, m):
    return (x + m - 1) // m * m


def _lstm_kernel(emb_ref, wih_ref, whh_ref, b_ref,
                 h_out_ref, cn_ref,
                 gx_sc, h_sc, c_sc,
                 *, seq_len, t_chunk, unroll, mask_tail):
    T, Bb, Ep = emb_ref.shape
    Hp = h_sc.shape[-1]
    H4p = 4 * Hp

    chunk = pl.program_id(1)

    @pl.when(chunk == 0)
    def _():
        h_sc[...] = jnp.zeros_like(h_sc)
        c_sc[...] = jnp.zeros_like(c_sc)

    # ---- per-chunk batched input projection: one MXU matmul for T steps ----
    # gx[t] = x_t @ W_ih^T + (b_ih + b_hh), gate columns already in (i,f,o,g).
    emb2d = emb_ref[...].reshape(T * Bb, Ep)
    gx = jnp.dot(emb2d, wih_ref[...], preferred_element_type=jnp.float32)
    gx_sc[...] = (gx + b_ref[...]).reshape(T, Bb, H4p)

    whh = whh_ref[...]                       # (Hp, 4Hp), resident for the loop
    # TODO(synk): if Hp fits one MXU weight tile, hold W_hh in MXU staging regs
    # (pltpu.matmul_push_rhs once, matmul_acc_lhs/pop per step) to cut the
    # serial per-step MXU cost further.

    def step(t, carry):
        h_prev, c_prev = carry               # carried in vregs, not VMEM
        gx_t = gx_sc[t]                      # (Bb, 4Hp) tile-aligned load

        # Only the recurrent matmul sits on the serial critical path.
        gates = gx_t + jnp.dot(h_prev.astype(whh.dtype), whh,
                               preferred_element_type=jnp.float32)   # (Bb, 4Hp)

        # Gate order (i, f, o, g): sigmoid over 3H lanes, tanh over H lanes.
        sig = jax.nn.sigmoid(gates[:, :3 * Hp])
        i_g = sig[:, 0 * Hp:1 * Hp]
        f_g = sig[:, 1 * Hp:2 * Hp]
        o_g = sig[:, 2 * Hp:3 * Hp]
        g_g = jnp.tanh(gates[:, 3 * Hp:4 * Hp])

        c_new = f_g * c_prev + i_g * g_g
        h_new = o_g * jnp.tanh(c_new)

        if mask_tail:
            # Padded tail timesteps (last chunk only) must not advance the
            # state; their h_out rows are sliced off in the wrapper.
            valid = (chunk * t_chunk + t) < seq_len
            h_new = jnp.where(valid, h_new, h_prev)
            c_new = jnp.where(valid, c_new, c_prev)

        h_out_ref[t] = h_new.astype(h_out_ref.dtype)   # lane-dense VMEM store
        return (h_new, c_new)

    h0 = h_sc[...]
    c0 = c_sc[...]
    h_f, c_f = lax.fori_loop(0, T, step, (h0, c0), unroll=unroll)

    # One scratch writeback per chunk (carry to next chunk) + resident c_n.
    h_sc[...] = h_f
    c_sc[...] = c_f
    cn_ref[0] = c_f


def _prep_gate_rows(w, h_dim, h_pad):
    """(4H, K) rows in torch order [i,f,g,o] -> (4*h_pad, K) rows in kernel
    order [i,f,o,g], each gate block zero-padded to h_pad rows."""
    k_dim = w.shape[1]
    out = jnp.zeros((4 * h_pad, k_dim), jnp.float32)
    for dst, src in enumerate((0, 1, 3, 2)):
        out = out.at[dst * h_pad:dst * h_pad + h_dim].set(
            w[src * h_dim:(src + 1) * h_dim].astype(jnp.float32))
    return out


def lstm_forward_pallas(embedded, w_ih, w_hh, b_ih, b_hh, *,
                        t_chunk=32, unroll=8, mxu_dtype=jnp.float32,
                        interpret=False):
    """embedded: (S, B, E) f32. Returns (h, (h_n, c_n)) like 1-layer nn.LSTM."""
    S, B, E = embedded.shape
    H = w_hh.shape[1]
    assert w_ih.shape[0] == 4 * H and w_ih.shape[1] == E

    # ---- tile-aligned / lane-dense padded sizes ----
    B_BLK = 8                                  # sublane tile; one batch block
    B_pad = _round_up(B, B_BLK)
    E_pad = _round_up(E, 128)
    H_pad = _round_up(H, 128)
    H4p = 4 * H_pad
    t_chunk = max(1, min(int(t_chunk), S))
    S_pad = _round_up(S, t_chunk)
    n_chunks = S_pad // t_chunk
    n_bblocks = B_pad // B_BLK
    unroll_eff = max(1, min(int(unroll), t_chunk))

    # ---- weight prep (glue): gate reorder + zero-pad + transpose + fuse bias
    # TODO(synk): at realistic widths (E, H >= 128) pass mxu_dtype=jnp.bfloat16
    # on v6e/v7x; carries/nonlinearities/accumulation stay f32 in the kernel.
    wih_p = _prep_gate_rows(w_ih, H, H_pad)                       # (4Hp, E)
    wih_p = jnp.zeros((H4p, E_pad), jnp.float32).at[:, :E].set(wih_p)
    wih_t = wih_p.T.astype(mxu_dtype)                             # (E_pad, 4Hp)

    whh_p = _prep_gate_rows(w_hh, H, H_pad)                       # (4Hp, H)
    whh_p = jnp.zeros((H4p, H_pad), jnp.float32).at[:, :H].set(whh_p)
    whh_t = whh_p.T.astype(mxu_dtype)                             # (H_pad, 4Hp)

    bias = _prep_gate_rows((b_ih + b_hh).reshape(4 * H, 1), H, H_pad)
    bias = bias.reshape(1, H4p).astype(jnp.float32)

    emb_pad = jnp.zeros((S_pad, B_pad, E_pad), jnp.float32)
    emb_pad = emb_pad.at[:S, :B, :E].set(embedded.astype(jnp.float32))
    emb_pad = emb_pad.astype(mxu_dtype)

    out_shapes = (
        jax.ShapeDtypeStruct((S_pad, B_pad, H_pad), jnp.float32),   # h (all t)
        jax.ShapeDtypeStruct((1, B_pad, H_pad), jnp.float32),       # c_n
    )

    grid_spec = pltpu.PrefetchScalarGridSpec(
        num_scalar_prefetch=0,
        grid=(n_bblocks, n_chunks),
        in_specs=[
            pl.BlockSpec((t_chunk, B_BLK, E_pad), lambda b, c: (c, b, 0)),
            pl.BlockSpec((E_pad, H4p), lambda b, c: (0, 0)),     # W_ih^T resident
            pl.BlockSpec((H_pad, H4p), lambda b, c: (0, 0)),     # W_hh^T resident
            pl.BlockSpec((1, H4p), lambda b, c: (0, 0)),         # fused bias
        ],
        out_specs=[
            pl.BlockSpec((t_chunk, B_BLK, H_pad), lambda b, c: (c, b, 0)),
            pl.BlockSpec((1, B_BLK, H_pad), lambda b, c: (0, b, 0)),
        ],
        scratch_shapes=[
            pltpu.VMEM((t_chunk, B_BLK, H4p), jnp.float32),  # per-chunk gates_x
            pltpu.VMEM((B_BLK, H_pad), jnp.float32),         # h carry (per chunk)
            pltpu.VMEM((B_BLK, H_pad), jnp.float32),         # c carry (per chunk)
        ],
    )

    mxu_bytes = jnp.dtype(mxu_dtype).itemsize
    vmem_est = (
        2 * t_chunk * B_BLK * E_pad * mxu_bytes      # emb blocks (dbl-buffered)
        + 2 * t_chunk * B_BLK * H_pad * 4            # h_out blocks
        + 2 * B_BLK * H_pad * 4                      # c_n block
        + 2 * E_pad * H4p * mxu_bytes                # W_ih^T
        + 2 * H_pad * H4p * mxu_bytes                # W_hh^T
        + 2 * H4p * 4                                # bias
        + t_chunk * B_BLK * H4p * 4                  # gx scratch
        + 2 * B_BLK * H_pad * 4                      # h/c scratch
    )
    vmem_limit = int(min(max(vmem_est * 2 + (4 << 20), 16 << 20), 60 << 20))

    kernel = functools.partial(
        _lstm_kernel, seq_len=S, t_chunk=t_chunk, unroll=unroll_eff,
        mask_tail=(S_pad != S))

    h_all_p, c_n_p = pl.pallas_call(
        kernel,
        out_shape=out_shapes,
        grid_spec=grid_spec,
        compiler_params=pltpu.CompilerParams(
            dimension_semantics=("parallel", "arbitrary"),
            vmem_limit_bytes=vmem_limit),
        interpret=interpret,
    )(emb_pad, wih_t, whh_t, bias)

    h_all = h_all_p[:S, :B, :H]
    c_n = c_n_p[:, :B, :H]
    h_n = h_all[S - 1:S]                       # (1, B, H) == h_all[-1]
    return h_all, (h_n, c_n)


def pe_subjectivity_lstm_forward(x, weights_matrix, w_ih, w_hh, b_ih, b_hh, **kw):
    """Full forward: embedding lookup (XLA glue) + Pallas LSTM kernel.
    nn.LSTM dropout is a no-op for n_layers=1, so nothing to apply."""
    embedded = jnp.take(weights_matrix, x, axis=0)   # (S, B, E)
    return lstm_forward_pallas(embedded, w_ih, w_hh, b_ih, b_hh, **kw)


def _reference_lstm(embedded, w_ih, w_hh, b_ih, b_hh):
    """Pure-JAX reference of torch.nn.LSTM (1 layer) for a sanity check."""
    S, B, E = embedded.shape
    H = w_hh.shape[1]
    h = jnp.zeros((B, H), jnp.float32)
    c = jnp.zeros((B, H), jnp.float32)
    hs = []
    for t in range(S):
        gates = embedded[t] @ w_ih.T + h @ w_hh.T + b_ih + b_hh
        i = jax.nn.sigmoid(gates[:, 0 * H:1 * H])
        f = jax.nn.sigmoid(gates[:, 1 * H:2 * H])
        g = jnp.tanh(gates[:, 2 * H:3 * H])
        o = jax.nn.sigmoid(gates[:, 3 * H:4 * H])
        c = f * c + i * g
        h = o * jnp.tanh(c)
        hs.append(h)
    return jnp.stack(hs, 0), (h[None], c[None])


if __name__ == "__main__":
    vocab, emb_dim, h_dim = 20, 16, 32
    seq_len, batch = 8, 2

    key = jax.random.PRNGKey(0)
    k_emb, k_wih, k_whh, k_bih, k_bhh, k_x = jax.random.split(key, 6)

    # Pretrained embedding table ("weights_matrix").
    weights_matrix = jax.random.normal(k_emb, (vocab, emb_dim), jnp.float32)

    # LSTM params, PyTorch-style uniform(-1/sqrt(H), 1/sqrt(H)) init.
    bound = 1.0 / math.sqrt(h_dim)
    w_ih = jax.random.uniform(k_wih, (4 * h_dim, emb_dim), jnp.float32, -bound, bound)
    w_hh = jax.random.uniform(k_whh, (4 * h_dim, h_dim), jnp.float32, -bound, bound)
    b_ih = jax.random.uniform(k_bih, (4 * h_dim,), jnp.float32, -bound, bound)
    b_hh = jax.random.uniform(k_bhh, (4 * h_dim,), jnp.float32, -bound, bound)

    # Token ids, time-major (seq_len, batch) like nn.LSTM's default layout.
    x = jax.random.randint(k_x, (seq_len, batch), 0, vocab, jnp.int32)

    # t_chunk=4 -> two time chunks, exercising the streamed/pipelined path.
    h_out, (h_n, c_n) = pe_subjectivity_lstm_forward(
        x, weights_matrix, w_ih, w_hh, b_ih, b_hh, t_chunk=4, unroll=4)
    jax.block_until_ready((h_out, h_n, c_n))

    # Sanity check against pure-JAX reference.
    embedded = jnp.take(weights_matrix, x, axis=0)
    h_ref, (hn_ref, cn_ref) = _reference_lstm(embedded, w_ih, w_hh, b_ih, b_hh)
    assert h_out.shape == (seq_len, batch, h_dim)
    assert h_n.shape == (1, batch, h_dim) and c_n.shape == (1, batch, h_dim)
    assert jnp.allclose(h_out, h_ref, atol=2e-5), "h mismatch"
    assert jnp.allclose(h_n, hn_ref, atol=2e-5), "h_n mismatch"
    assert jnp.allclose(c_n, cn_ref, atol=2e-5), "c_n mismatch"

    print("KERNEL_OK")
</pallas_src>

<mosaic_0001>
module attributes {stable_mosaic.version = 11 : i64} {
  func.func @_lstm_kernel(%arg0: i32, %arg1: i32, %arg2: memref<4x8x128xf32, #tpu.memory_space<vmem>>, %arg3: memref<128x512xf32, #tpu.memory_space<vmem>>, %arg4: memref<128x512xf32, #tpu.memory_space<vmem>>, %arg5: memref<1x512xf32, #tpu.memory_space<vmem>>, %arg6: memref<4x8x128xf32, #tpu.memory_space<vmem>>, %arg7: memref<1x8x128xf32, #tpu.memory_space<vmem>>, %arg8: memref<4x8x512xf32, #tpu.memory_space<vmem>>, %arg9: memref<8x128xf32, #tpu.memory_space<vmem>>, %arg10: memref<8x128xf32, #tpu.memory_space<vmem>>) attributes {dimension_semantics = [#tpu.dimension_semantics<parallel>, #tpu.dimension_semantics<arbitrary>], iteration_bounds = array<i64: 1, 2>, scalar_prefetch = 0 : i64, scratch_operands = 3 : i64, tpu.core_type = #tpu.core_type<tc>, window_params = [{transform_indices = @transform_0, window_bounds = array<i64: 4, 8, 128>}, {pipeline_mode = #tpu.pipeline_mode<synchronous>, transform_indices = @transform_1, window_bounds = array<i64: 128, 512>}, {pipeline_mode = #tpu.pipeline_mode<synchronous>, transform_indices = @transform_2, window_bounds = array<i64: 128, 512>}, {pipeline_mode = #tpu.pipeline_mode<synchronous>, transform_indices = @transform_3, window_bounds = array<i64: 1, 512>}, {transform_indices = @transform_4, window_bounds = array<i64: 4, 8, 128>}, {transform_indices = @transform_5, window_bounds = array<i64: 1, 8, 128>}]} {
    %c0_i32 = arith.constant 0 : i32
    %0 = arith.cmpi eq, %arg1, %c0_i32 : i32
    %1 = arith.extui %0 : i1 to i32
    %c0_i32_0 = arith.constant 0 : i32
    %2 = arith.cmpi ne, %1, %c0_i32_0 : i32
    scf.if %2 {
      %cst_48 = arith.constant 0.000000e+00 : f32
      %120 = vector.broadcast %cst_48 : f32 to vector<8x128xf32>
      %c0_49 = arith.constant 0 : index
      %c0_50 = arith.constant 0 : index
      %121 = vector.load %arg9[%c0_49, %c0_50] : memref<8x128xf32, #tpu.memory_space<vmem>>, vector<8x128xf32>
      tpu.vector_store %arg9[%c0_49, %c0_50], %120 {strides = array<i32>} : memref<8x128xf32, #tpu.memory_space<vmem>>, vector<8x128xf32>,
      %cst_51 = arith.constant 0.000000e+00 : f32
      %122 = vector.broadcast %cst_51 : f32 to vector<8x128xf32>
      %c0_52 = arith.constant 0 : index
      %c0_53 = arith.constant 0 : index
      %123 = vector.load %arg10[%c0_52, %c0_53] : memref<8x128xf32, #tpu.memory_space<vmem>>, vector<8x128xf32>
      tpu.vector_store %arg10[%c0_52, %c0_53], %122 {strides = array<i32>} : memref<8x128xf32, #tpu.memory_space<vmem>>, vector<8x128xf32>,
    } else {
    }
    %c0 = arith.constant 0 : index
    %c0_1 = arith.constant 0 : index
    %c0_2 = arith.constant 0 : index
    %3 = vector.load %arg2[%c0, %c0_1, %c0_2] : memref<4x8x128xf32, #tpu.memory_space<vmem>>, vector<4x8x128xf32>
    %4 = vector.shape_cast %3 : vector<4x8x128xf32> to vector<32x128xf32>
    %c0_3 = arith.constant 0 : index
    %c0_4 = arith.constant 0 : index
    %5 = vector.load %arg3[%c0_3, %c0_4] : memref<128x512xf32, #tpu.memory_space<vmem>>, vector<128x512xf32>
    %cst = arith.constant dense<0.000000e+00> : vector<32x512xf32>
    %6 = tpu.matmul %4, %5, %cst {dimension_numbers = #tpu.dot_dimension_numbers<[1], [0], [0], [1], [0, 0, 1, 1], [], []>} : vector<32x128xf32>, vector<128x512xf32>, vector<32x512xf32> -> vector<32x512xf32>
    %c0_5 = arith.constant 0 : index
    %c0_6 = arith.constant 0 : index
    %7 = vector.load %arg5[%c0_5, %c0_6] : memref<1x512xf32, #tpu.memory_space<vmem>>, vector<1x512xf32>
    %8 = vector.broadcast %7 : vector<1x512xf32> to vector<32x512xf32>
    %9 = arith.addf %6, %8 : vector<32x512xf32>
    %10 = vector.shape_cast %9 : vector<32x512xf32> to vector<4x8x512xf32>
    %c0_7 = arith.constant 0 : index
    %c0_8 = arith.constant 0 : index
    %c0_9 = arith.constant 0 : index
    %11 = vector.load %arg8[%c0_7, %c0_8, %c0_9] : memref<4x8x512xf32, #tpu.memory_space<vmem>>, vector<4x8x512xf32>
    tpu.vector_store %arg8[%c0_7, %c0_8, %c0_9], %10 {strides = array<i32>} : memref<4x8x512xf32, #tpu.memory_space<vmem>>, vector<4x8x512xf32>,
    %c0_10 = arith.constant 0 : index
    %c0_11 = arith.constant 0 : index
    %12 = vector.load %arg4[%c0_10, %c0_11] : memref<128x512xf32, #tpu.memory_space<vmem>>, vector<128x512xf32>
    %c0_12 = arith.constant 0 : index
    %c0_13 = arith.constant 0 : index
    %13 = vector.load %arg9[%c0_12, %c0_13] : memref<8x128xf32, #tpu.memory_space<vmem>>, vector<8x128xf32>
    %c0_14 = arith.constant 0 : index
    %c0_15 = arith.constant 0 : index
    %14 = vector.load %arg10[%c0_14, %c0_15] : memref<8x128xf32, #tpu.memory_space<vmem>>, vector<8x128xf32>
    %c0_i32_16 = arith.constant 0 : i32
    %15 = arith.index_cast %c0_i32_16 : i32 to index
    %c0_17 = arith.constant 0 : index
    %c0_18 = arith.constant 0 : index
    %16 = vector.load %arg8[%15, %c0_17, %c0_18] : memref<4x8x512xf32, #tpu.memory_space<vmem>>, vector<1x8x512xf32>
    %17 = vector.shape_cast %16 : vector<1x8x512xf32> to vector<8x512xf32>
    %cst_19 = arith.constant dense<0.000000e+00> : vector<8x512xf32>
    %18 = tpu.matmul %13, %12, %cst_19 {dimension_numbers = #tpu.dot_dimension_numbers<[1], [0], [0], [1], [0, 0, 1, 1], [], []>} : vector<8x128xf32>, vector<128x512xf32>, vector<8x512xf32> -> vector<8x512xf32>
    %19 = arith.addf %17, %18 : vector<8x512xf32>
    %20 = vector.extract_strided_slice %19 {offsets = [0, 0], sizes = [8, 384], strides = [1, 1]} : vector<8x512xf32> to vector<8x384xf32>
    %21 = arith.negf %20 : vector<8x384xf32>
    %22 = math.exp %21 : vector<8x384xf32>
    %cst_20 = arith.constant 1.000000e+00 : f32
    %23 = vector.broadcast %cst_20 : f32 to vector<8x384xf32>
    %24 = arith.addf %23, %22 : vector<8x384xf32>
    %25 = arith.divf %23, %24 : vector<8x384xf32>
    %26 = vector.extract_strided_slice %25 {offsets = [0, 0], sizes = [8, 128], strides = [1, 1]} : vector<8x384xf32> to vector<8x128xf32>
    %27 = vector.extract_strided_slice %25 {offsets = [0, 128], sizes = [8, 128], strides = [1, 1]} : vector<8x384xf32> to vector<8x128xf32>
    %28 = vector.extract_strided_slice %25 {offsets = [0, 256], sizes = [8, 128], strides = [1, 1]} : vector<8x384xf32> to vector<8x128xf32>
    %29 = vector.extract_strided_slice %19 {offsets = [0, 384], sizes = [8, 128], strides = [1, 1]} : vector<8x512xf32> to vector<8x128xf32>
    %30 = math.tanh %29 : vector<8x128xf32>
    %31 = arith.mulf %27, %14 : vector<8x128xf32>
    %32 = arith.mulf %26, %30 : vector<8x128xf32>
    %33 = arith.addf %31, %32 : vector<8x128xf32>
    %34 = math.tanh %33 : vector<8x128xf32>
    %35 = arith.mulf %28, %34 : vector<8x128xf32>
    %36 = arith.index_cast %c0_i32_16 : i32 to index
    %c0_21 = arith.constant 0 : index
    %c0_22 = arith.constant 0 : index
    %37 = vector.load %arg6[%36, %c0_21, %c0_22] : memref<4x8x128xf32, #tpu.memory_space<vmem>>, vector<1x8x128xf32>
    %38 = vector.shape_cast %37 : vector<1x8x128xf32> to vector<8x128xf32>
    %39 = vector.shape_cast %35 : vector<8x128xf32> to vector<1x8x128xf32>
    tpu.vector_store %arg6[%36, %c0_21, %c0_22], %39 {strides = array<i32>} : memref<4x8x128xf32, #tpu.memory_space<vmem>>, vector<1x8x128xf32>,
    %c1_i32 = arith.constant 1 : i32
    %40 = arith.index_cast %c1_i32 : i32 to index
    %c0_23 = arith.constant 0 : index
    %c0_24 = arith.constant 0 : index
    %41 = vector.load %arg8[%40, %c0_23, %c0_24] : memref<4x8x512xf32, #tpu.memory_space<vmem>>, vector<1x8x512xf32>
    %42 = vector.shape_cast %41 : vector<1x8x512xf32> to vector<8x512xf32>
    %cst_25 = arith.constant dense<0.000000e+00> : vector<8x512xf32>
    %43 = tpu.matmul %35, %12, %cst_25 {dimension_numbers = #tpu.dot_dimension_numbers<[1], [0], [0], [1], [0, 0, 1, 1], [], []>} : vector<8x128xf32>, vector<128x512xf32>, vector<8x512xf32> -> vector<8x512xf32>
    %44 = arith.addf %42, %43 : vector<8x512xf32>
    %45 = vector.extract_strided_slice %44 {offsets = [0, 0], sizes = [8, 384], strides = [1, 1]} : vector<8x512xf32> to vector<8x384xf32>
    %46 = arith.negf %45 : vector<8x384xf32>
    %47 = math.exp %46 : vector<8x384xf32>
    %cst_26 = arith.constant 1.000000e+00 : f32
    %48 = vector.broadcast %cst_26 : f32 to vector<8x384xf32>
    %49 = arith.addf %48, %47 : vector<8x384xf32>
    %50 = arith.divf %48, %49 : vector<8x384xf32>
    %51 = vector.extract_strided_slice %50 {offsets = [0, 0], sizes = [8, 128], strides = [1, 1]} : vector<8x384xf32> to vector<8x128xf32>
    %52 = vector.extract_strided_slice %50 {offsets = [0, 128], sizes = [8, 128], strides = [1, 1]} : vector<8x384xf32> to vector<8x128xf32>
    %53 = vector.extract_strided_slice %50 {offsets = [0, 256], sizes = [8, 128], strides = [1, 1]} : vector<8x384xf32> to vector<8x128xf32>
    %54 = vector.extract_strided_slice %44 {offsets = [0, 384], sizes = [8, 128], strides = [1, 1]} : vector<8x512xf32> to vector<8x128xf32>
    %55 = math.tanh %54 : vector<8x128xf32>
    %56 = arith.mulf %52, %33 : vector<8x128xf32>
    %57 = arith.mulf %51, %55 : vector<8x128xf32>
    %58 = arith.addf %56, %57 : vector<8x128xf32>
    %59 = math.tanh %58 : vector<8x128xf32>
    %60 = arith.mulf %53, %59 : vector<8x128xf32>
    %61 = arith.index_cast %c1_i32 : i32 to index
    %c0_27 = arith.constant 0 : index
    %c0_28 = arith.constant 0 : index
    %62 = vector.load %arg6[%61, %c0_27, %c0_28] : memref<4x8x128xf32, #tpu.memory_space<vmem>>, vector<1x8x128xf32>
    %63 = vector.shape_cast %62 : vector<1x8x128xf32> to vector<8x128xf32>
    %64 = vector.shape_cast %60 : vector<8x128xf32> to vector<1x8x128xf32>
    tpu.vector_store %arg6[%61, %c0_27, %c0_28], %64 {strides = array<i32>} : memref<4x8x128xf32, #tpu.memory_space<vmem>>, vector<1x8x128xf32>,
    %c2_i32 = arith.constant 2 : i32
    %65 = arith.index_cast %c2_i32 : i32 to index
    %c0_29 = arith.constant 0 : index
    %c0_30 = arith.constant 0 : index
    %66 = vector.load %arg8[%65, %c0_29, %c0_30] : memref<4x8x512xf32, #tpu.memory_space<vmem>>, vector<1x8x512xf32>
    %67 = vector.shape_cast %66 : vector<1x8x512xf32> to vector<8x512xf32>
    %cst_31 = arith.constant dense<0.000000e+00> : vector<8x512xf32>
    %68 = tpu.matmul %60, %12, %cst_31 {dimension_numbers = #tpu.dot_dimension_numbers<[1], [0], [0], [1], [0, 0, 1, 1], [], []>} : vector<8x128xf32>, vector<128x512xf32>, vector<8x512xf32> -> vector<8x512xf32>
    %69 = arith.addf %67, %68 : vector<8x512xf32>
    %70 = vector.extract_strided_slice %69 {offsets = [0, 0], sizes = [8, 384], strides = [1, 1]} : vector<8x512xf32> to vector<8x384xf32>
    %71 = arith.negf %70 : vector<8x384xf32>
    %72 = math.exp %71 : vector<8x384xf32>
    %cst_32 = arith.constant 1.000000e+00 : f32
    %73 = vector.broadcast %cst_32 : f32 to vector<8x384xf32>
    %74 = arith.addf %73, %72 : vector<8x384xf32>
    %75 = arith.divf %73, %74 : vector<8x384xf32>
    %76 = vector.extract_strided_slice %75 {offsets = [0, 0], sizes = [8, 128], strides = [1, 1]} : vector<8x384xf32> to vector<8x128xf32>
    %77 = vector.extract_strided_slice %75 {offsets = [0, 128], sizes = [8, 128], strides = [1, 1]} : vector<8x384xf32> to vector<8x128xf32>
    %78 = vector.extract_strided_slice %75 {offsets = [0, 256], sizes = [8, 128], strides = [1, 1]} : vector<8x384xf32> to vector<8x128xf32>
    %79 = vector.extract_strided_slice %69 {offsets = [0, 384], sizes = [8, 128], strides = [1, 1]} : vector<8x512xf32> to vector<8x128xf32>
    %80 = math.tanh %79 : vector<8x128xf32>
    %81 = arith.mulf %77, %58 : vector<8x128xf32>
    %82 = arith.mulf %76, %80 : vector<8x128xf32>
    %83 = arith.addf %81, %82 : vector<8x128xf32>
    %84 = math.tanh %83 : vector<8x128xf32>
    %85 = arith.mulf %78, %84 : vector<8x128xf32>
    %86 = arith.index_cast %c2_i32 : i32 to index
    %c0_33 = arith.constant 0 : index
    %c0_34 = arith.constant 0 : index
    %87 = vector.load %arg6[%86, %c0_33, %c0_34] : memref<4x8x128xf32, #tpu.memory_space<vmem>>, vector<1x8x128xf32>
    %88 = vector.shape_cast %87 : vector<1x8x128xf32> to vector<8x128xf32>
    %89 = vector.shape_cast %85 : vector<8x128xf32> to vector<1x8x128xf32>
    tpu.vector_store %arg6[%86, %c0_33, %c0_34], %89 {strides = array<i32>} : memref<4x8x128xf32, #tpu.memory_space<vmem>>, vector<1x8x128xf32>,
    %c3_i32 = arith.constant 3 : i32
    %90 = arith.index_cast %c3_i32 : i32 to index
    %c0_35 = arith.constant 0 : index
    %c0_36 = arith.constant 0 : index
    %91 = vector.load %arg8[%90, %c0_35, %c0_36] : memref<4x8x512xf32, #tpu.memory_space<vmem>>, vector<1x8x512xf32>
    %92 = vector.shape_cast %91 : vector<1x8x512xf32> to vector<8x512xf32>
    %cst_37 = arith.constant dense<0.000000e+00> : vector<8x512xf32>
    %93 = tpu.matmul %85, %12, %cst_37 {dimension_numbers = #tpu.dot_dimension_numbers<[1], [0], [0], [1], [0, 0, 1, 1], [], []>} : vector<8x128xf32>, vector<128x512xf32>, vector<8x512xf32> -> vector<8x512xf32>
    %94 = arith.addf %92, %93 : vector<8x512xf32>
    %95 = vector.extract_strided_slice %94 {offsets = [0, 0], sizes = [8, 384], strides = [1, 1]} : vector<8x512xf32> to vector<8x384xf32>
    %96 = arith.negf %95 : vector<8x384xf32>
    %97 = math.exp %96 : vector<8x384xf32>
    %cst_38 = arith.constant 1.000000e+00 : f32
    %98 = vector.broadcast %cst_38 : f32 to vector<8x384xf32>
    %99 = arith.addf %98, %97 : vector<8x384xf32>
    %100 = arith.divf %98, %99 : vector<8x384xf32>
    %101 = vector.extract_strided_slice %100 {offsets = [0, 0], sizes = [8, 128], strides = [1, 1]} : vector<8x384xf32> to vector<8x128xf32>
    %102 = vector.extract_strided_slice %100 {offsets = [0, 128], sizes = [8, 128], strides = [1, 1]} : vector<8x384xf32> to vector<8x128xf32>
    %103 = vector.extract_strided_slice %100 {offsets = [0, 256], sizes = [8, 128], strides = [1, 1]} : vector<8x384xf32> to vector<8x128xf32>
    %104 = vector.extract_strided_slice %94 {offsets = [0, 384], sizes = [8, 128], strides = [1, 1]} : vector<8x512xf32> to vector<8x128xf32>
    %105 = math.tanh %104 : vector<8x128xf32>
    %106 = arith.mulf %102, %83 : vector<8x128xf32>
    %107 = arith.mulf %101, %105 : vector<8x128xf32>
    %108 = arith.addf %106, %107 : vector<8x128xf32>
    %109 = math.tanh %108 : vector<8x128xf32>
    %110 = arith.mulf %103, %109 : vector<8x128xf32>
    %111 = arith.index_cast %c3_i32 : i32 to index
    %c0_39 = arith.constant 0 : index
    %c0_40 = arith.constant 0 : index
    %112 = vector.load %arg6[%111, %c0_39, %c0_40] : memref<4x8x128xf32, #tpu.memory_space<vmem>>, vector<1x8x128xf32>
    %113 = vector.shape_cast %112 : vector<1x8x128xf32> to vector<8x128xf32>
    %114 = vector.shape_cast %110 : vector<8x128xf32> to vector<1x8x128xf32>
    tpu.vector_store %arg6[%111, %c0_39, %c0_40], %114 {strides = array<i32>} : memref<4x8x128xf32, #tpu.memory_space<vmem>>, vector<1x8x128xf32>,
    %c4_i32 = arith.constant 4 : i32
    %c0_41 = arith.constant 0 : index
    %c0_42 = arith.constant 0 : index
    %115 = vector.load %arg9[%c0_41, %c0_42] : memref<8x128xf32, #tpu.memory_space<vmem>>, vector<8x128xf32>
    tpu.vector_store %arg9[%c0_41, %c0_42], %110 {strides = array<i32>} : memref<8x128xf32, #tpu.memory_space<vmem>>, vector<8x128xf32>,
    %c0_43 = arith.constant 0 : index
    %c0_44 = arith.constant 0 : index
    %116 = vector.load %arg10[%c0_43, %c0_44] : memref<8x128xf32, #tpu.memory_space<vmem>>, vector<8x128xf32>
    tpu.vector_store %arg10[%c0_43, %c0_44], %108 {strides = array<i32>} : memref<8x128xf32, #tpu.memory_space<vmem>>, vector<8x128xf32>,
    %c0_45 = arith.constant 0 : index
    %c0_46 = arith.constant 0 : index
    %c0_47 = arith.constant 0 : index
    %117 = vector.load %arg7[%c0_45, %c0_46, %c0_47] : memref<1x8x128xf32, #tpu.memory_space<vmem>>, vector<1x8x128xf32>
    %118 = vector.shape_cast %117 : vector<1x8x128xf32> to vector<8x128xf32>
    %119 = vector.shape_cast %108 : vector<8x128xf32> to vector<1x8x128xf32>
    tpu.vector_store %arg7[%c0_45, %c0_46, %c0_47], %119 {strides = array<i32>} : memref<1x8x128xf32, #tpu.memory_space<vmem>>, vector<1x8x128xf32>,
    return
  }
  func.func @transform_0(%arg0: i32, %arg1: i32) -> (i32, i32, i32) {
    %c0_i32 = arith.constant 0 : i32
    %c0_i32_0 = arith.constant 0 : i32
    return %arg1, %arg0, %c0_i32 : i32, i32, i32
  }
  func.func @transform_1(%arg0: i32, %arg1: i32) -> (i32, i32) {
    %c0_i32 = arith.constant 0 : i32
    %c0_i32_0 = arith.constant 0 : i32
    %c0_i32_1 = arith.constant 0 : i32
    return %c0_i32, %c0_i32_0 : i32, i32
  }
  func.func @transform_2(%arg0: i32, %arg1: i32) -> (i32, i32) {
    %c0_i32 = arith.constant 0 : i32
    %c0_i32_0 = arith.constant 0 : i32
    %c0_i32_1 = arith.constant 0 : i32
    return %c0_i32, %c0_i32_0 : i32, i32
  }
  func.func @transform_3(%arg0: i32, %arg1: i32) -> (i32, i32) {
    %c0_i32 = arith.constant 0 : i32
    %c0_i32_0 = arith.constant 0 : i32
    %c0_i32_1 = arith.constant 0 : i32
    return %c0_i32, %c0_i32_0 : i32, i32
  }
  func.func @transform_4(%arg0: i32, %arg1: i32) -> (i32, i32, i32) {
    %c0_i32 = arith.constant 0 : i32
    %c0_i32_0 = arith.constant 0 : i32
    return %arg1, %arg0, %c0_i32 : i32, i32, i32
  }
  func.func @transform_5(%arg0: i32, %arg1: i32) -> (i32, i32, i32) {
    %c0_i32 = arith.constant 0 : i32
    %c0_i32_0 = arith.constant 0 : i32
    %c0_i32_1 = arith.constant 0 : i32
    return %c0_i32, %arg0, %c0_i32_0 : i32, i32, i32
  }
}

</mosaic_0001>

<bundles_post_ra>
// kernel: tpu_custom_call.1
= control target key start
LH: loop header
LB: loop body
LE: loop exit
PB: predicated region body
PF: predicated region fallthrough
CT: control target
= control target key end

     0   :  { %s2495_s0 = inlined_call_operand.hbm [shape: f32[8,8,128], index: 0, kind: input, shape index: {}]   ;;  %s2496_s1 = inlined_call_operand.hbm [shape: f32[128,512], index: 1, kind: input, shape index: {}]   ;;  %s2497_s2 = inlined_call_operand.hbm [shape: f32[128,512], index: 2, kind: input, shape index: {}]   ;;  %s2498_s3 = inlined_call_operand.hbm [shape: f32[1,512], index: 3, kind: input, shape index: {}]   ;;  %s2499_s4 = inlined_call_operand.hbm [shape: f32[8,8,128], index: 4, kind: output, shape index: {0}]   ;;  %s2500_s5 = inlined_call_operand.hbm [shape: f32[1,8,128], index: 5, kind: output, shape index: {1}]  }
   0x1   :  { %2530 = sst [smem:[#allocation60_spill]] %s2496_s1 }
   0x2   :  { %2531 = sst [smem:[#allocation61_spill]] %s2497_s2 }
   0x3   :  { %2532 = sst [smem:[#allocation62_spill]] %s2498_s3 }
   0x4   :  { %11 = vsyncpa [#allocation6], 0 }
   0x5   :  { %13 = vsyncpa [#allocation6 + $0x1], 0 }
   0x6   :  { %14 = vsyncpa [#allocation9], 0 }
   0x7   :  { %15 = vsyncpa [#allocation12], 0 }
   0x8   :  { %16 = vsyncpa [#allocation7], 0 }
   0x9   :  { %18 = vsyncpa [#allocation7 + $0x1], 0 }
   0xa   :  { %19 = vsyncpa [#allocation15], 0  ;;  %s1871_s18 = smov 0   ;;  %s1873_s19 = smov 0  }
   0xb   :  { %s1875_s20 = smov 0   ;;  %s1877_s21 = smov 0  }
   0xc   :  { %s1879_s22 = smov 0   ;;  %s1881_s23 = smov 0  }
   0xd LB: > { %s1374_s24 = sadd.s32 4294967295, %s1828_s23   ;;  %s1375_s25 = sadd.s32 4294967294, %s1828_s23   ;;  %s1828_s23 = sphi %s1881_s23, %s25_s23   ;;  %s1824_s22 = sphi %s1879_s22, %s2627_s22   ;;  %s1820_s21 = sphi %s1877_s21, %s2626_s21   ;;  %s1816_s20 = sphi %s1875_s20, %s2625_s20   ;;  %s1812_s19 = sphi %s1873_s19, %s2624_s19   ;;  %s1808_s18 = sphi %s1871_s18, %s2623_s18  }
   0xe   : > { %p59_p0 = scmp.ne.s32.totalorder %s1812_s19, %s1808_s18  ;;  %p1905_p1 = scmp.eq.s32.totalorder %s1374_s24, 0 }
   0xf   : > { %p1909_p2 = scmp.eq.s32.totalorder %s1374_s24, 1  ;;  %p154_p3 = scmp.eq.s32.totalorder %s1375_s25, 1 }
  0x10   : > { %p1915_p4 = por %p1905_p1, %p59_p0  ;;  %p1376_p5 = scmp.ge.s32.totalorder %s1828_s23, 1 }
  0x11   : > { %p1920_p6 = por %p154_p3, %p59_p0  ;;  %p187_p7 = scmp.lt.s32.totalorder %s1828_s23, 3 }
  0x12   : > { %s2537_s1 = sld [smem:[#allocation60_spill]]  ;;  %s1830_s9 = smov [#allocation8]  }
  0x13   : > { %p1928_p8 = pnand %p1376_p5, %p187_p7  ;;  %s200_s10 = sshll.u32 %s1830_s9, 4  ;;  %s201_s10 = int_to_ptr.vmem [resolvable:$true] %s200_s10 }
  0x14   : > { %p1380_p11 = scmp.ge.s32.totalorder %s1828_s23, 2  ;;  %s2540_s2 = sld [smem:[#allocation61_spill]] }
  0x15   : > { %p1435_p9 = pneg %p1928_p8  ;;  %s1831_s15 = smov 512  }
  0x16   : > { %s1832_s16 = smov 32   ;;  %s1833_s17 = smov [#allocation10]  }
  0x17   : > { %p1936_p10 = pnand %p1435_p9, %p1905_p1  ;;  %s214_s24 = sshll.u32 %s1833_s17, 4  ;;  %s215_s24 = int_to_ptr.vmem [resolvable:$true] %s214_s24 }
  0x18   : > { %s198_s7 = sshll.u32 %s2537_s1, 4  ;;  %s2541_s3 = sld [smem:[#allocation62_spill]]  ;;  %s199_s7 = int_to_ptr.hbm [resolvable:$true] %s198_s7 }
  0x19   : > { %1438 = dma.hbm_to_vmem [thread:$0]  (!%p1936_p10), %s199_s7, 8192, %s201_s10, [#allocation9], %s1831_s15, %s1831_s15, %s1832_s16  }
  0x1a   : > { %s212_s14 = sshll.u32 %s2540_s2, 4  ;;  %s1834_s9 = smov [#allocation11]   ;;  %s213_s14 = int_to_ptr.hbm [resolvable:$true] %s212_s14 }
  0x1b   : > { %1441 = dma.hbm_to_vmem [thread:$0]  (!%p1936_p10), %s213_s14, 8192, %s215_s24, [#allocation9], %s1831_s15, %s1831_s15, %s1832_s16  }
  0x1c   : > { %s229_s12 = sshll.u32 %s1834_s9, 4  ;;  %s34_s7 = sadd.s32 1, %s1824_s22  ;;  %s230_s12 = int_to_ptr.vmem [resolvable:$true] %s229_s12 }
  0x1d   : > { %p35_p12 = scmp.ge.s32.totalorder %s34_s7, 2  ;;  %s46_s10 = sadd.s32 1, %s1816_s20 }
  0x1e   : > { %s227_s6 = sshll.u32 %s2541_s3, 4  ;;  %p53_p13 = scmp.ne.s32.totalorder %s1816_s20, %s1812_s19  ;;  %s228_s6 = int_to_ptr.hbm [resolvable:$true] %s227_s6 }
  0x1f   : > { %1444 = dma.hbm_to_vmem [thread:$0]  (!%p1936_p10), %s228_s6, 64, %s230_s12, [#allocation12]  }
  0x20   : > { %p54_p0 = scmp.eq.s32.totalorder %s1828_s23, 0  ;;  %s2629_s7 = smov (%p35_p12, %s34_s7), 0 }
  0x21   : > { %2542 = sst [smem:[#allocation21_spill]] %s2629_s7  ;;  %p1966_p5 = por %p1909_p2, %p53_p13 }
  0x22   : > { %p1960_p3 = por %p54_p0, %p53_p13  ;;  %s41_s11 = ssub.s32 %s1824_s22, %s2629_s7 }
  0x23   : > { %p1456_p7 = scmp.lt.s32.totalorder %s1828_s23, 2  ;;  %p44_p9 = scmp.eq.s32.totalorder %s41_s11, 0 }
  0x24   : > { %s240_s15 = sand.u32 1, %s1816_s20   ;;  %s1413_s24 = sshll.u32 %s1824_s22, 5 }
  0x25   : > { %s1381_s16 = sshll.u32 %s240_s15, 5  ;;  %s250_s6 = scalar_lea.hbm %s2495_s0, %s1413_s24 }
  0x26   : > { %s1975_s17 = scalar_select %p44_p9, %s1816_s20, %s46_s10  }
  0x27   : > { %s244_s9 = scalar_lea.vmem [#allocation5], %s1381_s16  ;;  %s251_s1 = sshll.u32 %s250_s6, 4  ;;  %s252_s1 = int_to_ptr.hbm [resolvable:$true] %s251_s1 }
  0x28   : > { %s253_s12 = sshll.u32 %s244_s9, 4  ;;  %p1446_p10 = pnand %p1456_p7, %p1960_p3  ;;  %s254_s12 = int_to_ptr.vmem [resolvable:$true] %s253_s12 }
  0x29   : > { %s241_s2 = scalar_lea.sflag [#allocation6], %s240_s15  ;;  %s1835_s3 = smov 128  }
  0x2a   : > { %s1836_s7 = smov 8   ;;  %265 = sbr.rel (%p1928_p8) target bundleno = 825 (0x339), region = 36 }
  0x2b   : > { %1448 = dma.hbm_to_vmem [thread:$0]  (!%p1446_p10), %s252_s1, 512, %s254_s12, %s241_s2, %s1835_s3, %s1835_s3, %s1836_s7  }
  0x2f   : > { %s1986_s10 = sand.u32 1, %s1812_s19  }
  0x30   : > { %s1385_s11 = sshll.u32 %s1986_s10, 5  ;;  %s268_s16 = scalar_lea.sflag [#allocation6], %s1986_s10 }
  0x31   : > { %s1990_s24 = scalar_lea.vmem [#allocation5], %s1385_s11 }
  0x32   : > { %1787 = dma.done.wait (%p1915_p4), %s268_s16, 512  }
  0x33   : > { %1789 = vsyncadd (%p1915_p4), %s268_s16, 4294966784 }
  0x34   : > { %1791 = dma.done.wait (%p1905_p1), [#allocation9], 16384  }
  0x35   : > { %1793 = vsyncadd (%p1905_p1), [#allocation9], 4294950912 }
  0x36   : > { %1795 = dma.done.wait (%p1905_p1), [#allocation12], 64  }
  0x37   : > { %1797 = vsyncadd (%p1905_p1), [#allocation12], 4294967232  ;;  %s2004_s1 = scalar_lea.vmem [#allocation13], %s1385_s11  ;;  %p1390_p8 = scmp.ne.s32.totalorder %s1820_s21, 0 }
  0x39   : > { %319 = sbr.rel (%p1390_p8) target bundleno = 65 (0x41), region = 56 }
  0x3e   : > { %v1837_v0 = vmov 0.0  }
  0x3f   : > { %320 = vst [vmem:[#allocation3] sm:$0xff] %v1837_v0 }
  0x40   : > { %321 = vst [vmem:[#allocation4] sm:$0xff] %v1837_v0 }
  0x41 PF: > { %v386_v1 = vld [vmem:[#allocation8 + $0x1e0] sm:$0xff]  ;;  %v387_v2 = vld [vmem:[#allocation8 + $0x1e8] sm:$0xff]  ;;  %v388_v3 = vld [vmem:[#allocation8 + $0x1f0] sm:$0xff]  ;;  %s1838_s2 = smov [#allocation14]   ;;  %s1248_s8 = sshll.u32 %s2500_s5, 4  ;;  %s1249_s8 = int_to_ptr.hbm [resolvable:$true] %s1248_s8 }
  0x42   : > { %400 = vmatpush.msra.mxu0 %v386_v1  ;;  %429 = vmatpush.msra.mxu1 %v387_v2  ;;  %v389_v4 = vld [vmem:[#allocation8 + $0x1f8] sm:$0xff]  ;;  %v382_v5 = vld [vmem:[#allocation8 + $0x1c0] sm:$0xff]  ;;  %v383_v6 = vld [vmem:[#allocation8 + $0x1c8] sm:$0xff]  ;;  %s1246_s3 = sshll.u32 %s1838_s2, 4  ;;  %s1414_s7 = sshll.u32 %s1820_s21, 5  ;;  %s1247_s3 = int_to_ptr.vmem [resolvable:$true] %s1246_s3 }
  0x43   : > { %458 = vmatpush.msra.mxu2 %v388_v3  ;;  %487 = vmatpush.msra.mxu3 %v389_v4  ;;  %v384_v7 = vld [vmem:[#allocation8 + $0x1d0] sm:$0xff]  ;;  %v385_v8 = vld [vmem:[#allocation8 + $0x1d8] sm:$0xff]  ;;  %v378_v9 = vld [vmem:[#allocation8 + $0x1a0] sm:$0xff]  ;;  %s1228_s25 = scalar_lea.hbm %s2499_s4, %s1414_s7  ;;  %s1229_s21 = sshll.u32 %s2004_s1, 4  ;;  %s1230_s21 = int_to_ptr.vmem [resolvable:$true] %s1229_s21 }
  0x44   : > { %401 = vmatpush.msra.mxu0 %v382_v5  ;;  %430 = vmatpush.msra.mxu1 %v383_v6  ;;  %v379_v10 = vld [vmem:[#allocation8 + $0x1a8] sm:$0xff]  ;;  %v380_v11 = vld [vmem:[#allocation8 + $0x1b0] sm:$0xff]  ;;  %v381_v12 = vld [vmem:[#allocation8 + $0x1b8] sm:$0xff]  ;;  %s1231_s30 = sshll.u32 %s1228_s25, 4  ;;  %s1216_s6 = scalar_lea.sflag [#allocation7], %s1986_s10  ;;  %s1232_s30 = int_to_ptr.hbm [resolvable:$true] %s1231_s30 }
  0x45   : > { %459 = vmatpush.msra.mxu2 %v384_v7  ;;  %488 = vmatpush.msra.mxu3 %v385_v8  ;;  %v374_v13 = vld [vmem:[#allocation8 + $0x180] sm:$0xff]  ;;  %v375_v14 = vld [vmem:[#allocation8 + $0x188] sm:$0xff]  ;;  %v376_v15 = vld [vmem:[#allocation8 + $0x190] sm:$0xff]  ;;  %s1748_s9 = sshra.s32 %s1232_s30, 4  ;;  %s1749_s9 = int_to_ptr.hbm [resolvable:$true] %s1748_s9 }
  0x46   : > { %402 = vmatpush.msra.mxu0 %v378_v9  ;;  %431 = vmatpush.msra.mxu1 %v379_v10  ;;  %v377_v16 = vld [vmem:[#allocation8 + $0x198] sm:$0xff]  ;;  %v370_v17 = vld [vmem:[#allocation8 + $0x160] sm:$0xff]  ;;  %v371_v18 = vld [vmem:[#allocation8 + $0x168] sm:$0xff]  ;;  %s1750_s12 = scalar_lea.hbm %s1749_s9, 32  ;;  %p1755_p13 = scmp.lt.s32.totalorder %s1749_s9, %s2499_s4 }
  0x47   : > { %460 = vmatpush.msra.mxu2 %v380_v11  ;;  %489 = vmatpush.msra.mxu3 %v381_v12  ;;  %v372_v19 = vld [vmem:[#allocation8 + $0x170] sm:$0xff]  ;;  %v373_v20 = vld [vmem:[#allocation8 + $0x178] sm:$0xff]  ;;  %v366_v21 = vld [vmem:[#allocation8 + $0x140] sm:$0xff]  ;;  %p1751_p1 = scmp.ne.s32.totalorder %s1749_s9, %s1750_s12 }
  0x48   : > { %403 = vmatpush.msra.mxu0 %v374_v13  ;;  %432 = vmatpush.msra.mxu1 %v375_v14  ;;  %v367_v22 = vld [vmem:[#allocation8 + $0x148] sm:$0xff]  ;;  %v368_v23 = vld [vmem:[#allocation8 + $0x150] sm:$0xff]  ;;  %v369_v24 = vld [vmem:[#allocation8 + $0x158] sm:$0xff] }
  0x49   : > { %461 = vmatpush.msra.mxu2 %v376_v15  ;;  %490 = vmatpush.msra.mxu3 %v377_v16  ;;  %v362_v25 = vld [vmem:[#allocation8 + $0x120] sm:$0xff]  ;;  %v363_v26 = vld [vmem:[#allocation8 + $0x128] sm:$0xff]  ;;  %v364_v27 = vld [vmem:[#allocation8 + $0x130] sm:$0xff]  ;;  %p1752_p4 = pnand %p1751_p1, %p1966_p5 }
  0x4a   : > { %404 = vmatpush.msra.mxu0 %v370_v17  ;;  %433 = vmatpush.msra.mxu1 %v371_v18  ;;  %v365_v28 = vld [vmem:[#allocation8 + $0x138] sm:$0xff]  ;;  %v358_v29 = vld [vmem:[#allocation8 + $0x100] sm:$0xff]  ;;  %v359_v30 = vld [vmem:[#allocation8 + $0x108] sm:$0xff] }
  0x4b   : > { %462 = vmatpush.msra.mxu2 %v372_v19  ;;  %491 = vmatpush.msra.mxu3 %v373_v20  ;;  %v360_v31 = vld [vmem:[#allocation8 + $0x110] sm:$0xff]  ;;  %v361_v32 = vld [vmem:[#allocation8 + $0x118] sm:$0xff]  ;;  %v354_v33 = vld [vmem:[#allocation8 + $0xe0] sm:$0xff]  ;;  %p1753_p12 = pneg %p1752_p4 }
  0x4c   : > { %405 = vmatpush.msra.mxu0 %v366_v21  ;;  %434 = vmatpush.msra.mxu1 %v367_v22  ;;  %v355_v34 = vld [vmem:[#allocation8 + $0xe8] sm:$0xff]  ;;  %v356_v35 = vld [vmem:[#allocation8 + $0xf0] sm:$0xff]  ;;  %v357_v36 = vld [vmem:[#allocation8 + $0xf8] sm:$0xff] }
  0x4d   : > { %463 = vmatpush.msra.mxu2 %v368_v23  ;;  %492 = vmatpush.msra.mxu3 %v369_v24  ;;  %v350_v37 = vld [vmem:[#allocation8 + $0xc0] sm:$0xff]  ;;  %v351_v38 = vld [vmem:[#allocation8 + $0xc8] sm:$0xff]  ;;  %v352_v39 = vld [vmem:[#allocation8 + $0xd0] sm:$0xff] }
  0x4e   : > { %406 = vmatpush.msra.mxu0 %v362_v25  ;;  %435 = vmatpush.msra.mxu1 %v363_v26  ;;  %v353_v40 = vld [vmem:[#allocation8 + $0xd8] sm:$0xff]  ;;  %v346_v41 = vld [vmem:[#allocation8 + $0xa0] sm:$0xff]  ;;  %v347_v42 = vld [vmem:[#allocation8 + $0xa8] sm:$0xff] }
  0x4f   : > { %464 = vmatpush.msra.mxu2 %v364_v27  ;;  %493 = vmatpush.msra.mxu3 %v365_v28  ;;  %v348_v43 = vld [vmem:[#allocation8 + $0xb0] sm:$0xff]  ;;  %v349_v44 = vld [vmem:[#allocation8 + $0xb8] sm:$0xff]  ;;  %v342_v45 = vld [vmem:[#allocation8 + $0x80] sm:$0xff] }
  0x50   : > { %407 = vmatpush.msra.mxu0 %v358_v29  ;;  %436 = vmatpush.msra.mxu1 %v359_v30  ;;  %v343_v46 = vld [vmem:[#allocation8 + $0x88] sm:$0xff]  ;;  %v344_v47 = vld [vmem:[#allocation8 + $0x90] sm:$0xff]  ;;  %v345_v48 = vld [vmem:[#allocation8 + $0x98] sm:$0xff] }
  0x51   : > { %465 = vmatpush.msra.mxu2 %v360_v31  ;;  %494 = vmatpush.msra.mxu3 %v361_v32  ;;  %v338_v49 = vld [vmem:[#allocation8 + $0x60] sm:$0xff]  ;;  %v339_v50 = vld [vmem:[#allocation8 + $0x68] sm:$0xff]  ;;  %v340_v51 = vld [vmem:[#allocation8 + $0x70] sm:$0xff] }
  0x52   : > { %408 = vmatpush.msra.mxu0 %v354_v33  ;;  %437 = vmatpush.msra.mxu1 %v355_v34  ;;  %v341_v52 = vld [vmem:[#allocation8 + $0x78] sm:$0xff]  ;;  %v334_v53 = vld [vmem:[#allocation8 + $0x40] sm:$0xff]  ;;  %v335_v54 = vld [vmem:[#allocation8 + $0x48] sm:$0xff] }
  0x53   : > { %466 = vmatpush.msra.mxu2 %v356_v35  ;;  %495 = vmatpush.msra.mxu3 %v357_v36  ;;  %v336_v55 = vld [vmem:[#allocation8 + $0x50] sm:$0xff]  ;;  %v337_v56 = vld [vmem:[#allocation8 + $0x58] sm:$0xff]  ;;  %v330_v57 = vld [vmem:[#allocation8 + $0x20] sm:$0xff] }
  0x54   : > { %409 = vmatpush.msra.mxu0 %v350_v37  ;;  %438 = vmatpush.msra.mxu1 %v351_v38  ;;  %v331_v58 = vld [vmem:[#allocation8 + $0x28] sm:$0xff]  ;;  %v332_v59 = vld [vmem:[#allocation8 + $0x30] sm:$0xff]  ;;  %v333_v60 = vld [vmem:[#allocation8 + $0x38] sm:$0xff] }
  0x55   : > { %467 = vmatpush.msra.mxu2 %v352_v39  ;;  %496 = vmatpush.msra.mxu3 %v353_v40  ;;  %v326_v61 = vld [vmem:[#allocation8] sm:$0xff]  ;;  %v327_v62 = vld [vmem:[#allocation8 + $0x8] sm:$0xff]  ;;  %v328_v63 = vld [vmem:[#allocation8 + $0x10] sm:$0xff] }
  0x56   : > { %410 = vmatpush.msra.mxu0 %v346_v41  ;;  %439 = vmatpush.msra.mxu1 %v347_v42  ;;  %v329_v0 = vld [vmem:[#allocation8 + $0x18] sm:$0xff]  ;;  %v322_v1 = vld [vmem:[%s1990_s24] sm:$0xff]  ;;  %v2010_v3 = vld [vmem:[#allocation10 + $0x1e8] sm:$0xff] }
  0x57   : > { %468 = vmatpush.msra.mxu2 %v348_v43  ;;  %497 = vmatpush.msra.mxu3 %v349_v44  ;;  %v2008_v2 = vld [vmem:[#allocation10 + $0x1e0] sm:$0xff]  ;;  %v2012_v4 = vld [vmem:[#allocation10 + $0x1f0] sm:$0xff]  ;;  %v2014_v5 = vld [vmem:[#allocation10 + $0x1f8] sm:$0xff] }
  0x58   : > { %411 = vmatpush.msra.mxu0 %v342_v45  ;;  %440 = vmatpush.msra.mxu1 %v343_v46  ;;  %v2016_v6 = vld [vmem:[#allocation10 + $0x1c0] sm:$0xff]  ;;  %v2018_v7 = vld [vmem:[#allocation10 + $0x1c8] sm:$0xff]  ;;  %v2022_v8 = vld [vmem:[#allocation10 + $0x1d0] sm:$0xff] }
  0x59   : > { %469 = vmatpush.msra.mxu2 %v344_v47  ;;  %498 = vmatpush.msra.mxu3 %v345_v48  ;;  %v2024_v9 = vld [vmem:[#allocation10 + $0x1d8] sm:$0xff]  ;;  %v2028_v10 = vld [vmem:[#allocation10 + $0x1a0] sm:$0xff]  ;;  %v2030_v11 = vld [vmem:[#allocation10 + $0x1a8] sm:$0xff] }
  0x5a   : > { %412 = vmatpush.msra.mxu0 %v338_v49  ;;  %441 = vmatpush.msra.mxu1 %v339_v50  ;;  %v2034_v12 = vld [vmem:[#allocation10 + $0x1b0] sm:$0xff]  ;;  %v2036_v13 = vld [vmem:[#allocation10 + $0x1b8] sm:$0xff]  ;;  %v2040_v14 = vld [vmem:[#allocation10 + $0x180] sm:$0xff] }
  0x5b   : > { %470 = vmatpush.msra.mxu2 %v340_v51  ;;  %499 = vmatpush.msra.mxu3 %v341_v52  ;;  %v2042_v15 = vld [vmem:[#allocation10 + $0x188] sm:$0xff]  ;;  %v2046_v16 = vld [vmem:[#allocation10 + $0x190] sm:$0xff]  ;;  %v2048_v17 = vld [vmem:[#allocation10 + $0x198] sm:$0xff] }
  0x5c   : > { %413 = vmatpush.msra.mxu0 %v334_v53  ;;  %442 = vmatpush.msra.mxu1 %v335_v54  ;;  %v323_v18 = vld [vmem:[%s1990_s24 + $0x8] sm:$0xff]  ;;  %v2057_v19 = vld [vmem:[#allocation10 + $0x160] sm:$0xff]  ;;  %v2061_v21 = vld [vmem:[#allocation10 + $0x170] sm:$0xff] }
  0x5d   : > { %471 = vmatpush.msra.mxu2 %v336_v55  ;;  %500 = vmatpush.msra.mxu3 %v337_v56  ;;  %v2059_v20 = vld [vmem:[#allocation10 + $0x168] sm:$0xff]  ;;  %v2063_v22 = vld [vmem:[#allocation10 + $0x178] sm:$0xff]  ;;  %v2065_v23 = vld [vmem:[#allocation10 + $0x140] sm:$0xff] }
  0x5e   : > { %414 = vmatpush.msra.mxu0 %v330_v57  ;;  %443 = vmatpush.msra.mxu1 %v331_v58  ;;  %v2067_v24 = vld [vmem:[#allocation10 + $0x148] sm:$0xff]  ;;  %v2071_v25 = vld [vmem:[#allocation10 + $0x150] sm:$0xff]  ;;  %v2073_v26 = vld [vmem:[#allocation10 + $0x158] sm:$0xff] }
  0x5f   : > { %472 = vmatpush.msra.mxu2 %v332_v59  ;;  %501 = vmatpush.msra.mxu3 %v333_v60  ;;  %v2077_v27 = vld [vmem:[#allocation10 + $0x120] sm:$0xff]  ;;  %v2079_v28 = vld [vmem:[#allocation10 + $0x128] sm:$0xff]  ;;  %v2083_v29 = vld [vmem:[#allocation10 + $0x130] sm:$0xff] }
  0x60   : > { %415 = vmatpush.msra.mxu0 %v326_v61  ;;  %444 = vmatpush.msra.mxu1 %v327_v62  ;;  %v2085_v30 = vld [vmem:[#allocation10 + $0x138] sm:$0xff]  ;;  %v2089_v31 = vld [vmem:[#allocation10 + $0x100] sm:$0xff]  ;;  %v2091_v32 = vld [vmem:[#allocation10 + $0x108] sm:$0xff] }
  0x61   : > { %473 = vmatpush.msra.mxu2 %v328_v63  ;;  %502 = vmatpush.msra.mxu3 %v329_v0  ;;  %v2095_v33 = vld [vmem:[#allocation10 + $0x110] sm:$0xff]  ;;  %v2097_v34 = vld [vmem:[#allocation10 + $0x118] sm:$0xff]  ;;  %v2106_v36 = vld [vmem:[#allocation10 + $0xe0] sm:$0xff] }
  0x62   : > { %416 = vmatmul.f32.vlgmr.msra.gmra.mxu0 %v322_v1  ;;  %445 = vmatmul.f32.vlgmr.msra.gmra.mxu1 %v322_v1  ;;  %v324_v35 = vld [vmem:[%s1990_s24 + $0x10] sm:$0xff]  ;;  %v2108_v37 = vld [vmem:[#allocation10 + $0xe8] sm:$0xff]  ;;  %v2112_v39 = vld [vmem:[#allocation10 + $0xf8] sm:$0xff] }
  0x63   : > { %474 = vmatmul.f32.vlgmr.msra.gmra.mxu2 %v322_v1  ;;  %503 = vmatmul.f32.vlgmr.msra.gmra.mxu3 %v322_v1  ;;  %v2110_v38 = vld [vmem:[#allocation10 + $0xf0] sm:$0xff]  ;;  %v2114_v40 = vld [vmem:[#allocation10 + $0xc0] sm:$0xff]  ;;  %v2116_v41 = vld [vmem:[#allocation10 + $0xc8] sm:$0xff] }
  0x64   : > { %602 = vmatpush.msrb.mxu0 %v2008_v2  ;;  %622 = vmatpush.msrb.mxu1 %v2010_v3  ;;  %v2120_v42 = vld [vmem:[#allocation10 + $0xd0] sm:$0xff]  ;;  %v2122_v43 = vld [vmem:[#allocation10 + $0xd8] sm:$0xff]  ;;  %v2126_v44 = vld [vmem:[#allocation10 + $0xa0] sm:$0xff] }
  0x65   : > { %642 = vmatpush.msrb.mxu2 %v2012_v4  ;;  %662 = vmatpush.msrb.mxu3 %v2014_v5  ;;  %2545 = vst [vmem:[#allocation22_spill] sm:$0xff] %v2120_v42  ;;  %v2128_v45 = vld [vmem:[#allocation10 + $0xa8] sm:$0xff]  ;;  %v2132_v46 = vld [vmem:[#allocation10 + $0xb0] sm:$0xff]  ;;  %v2134_v47 = vld [vmem:[#allocation10 + $0xb8] sm:$0xff] }
  0x66   : > { %603 = vmatpush.msrb.mxu0 %v2016_v6  ;;  %623 = vmatpush.msrb.mxu1 %v2018_v7  ;;  %2546 = vst [vmem:[#allocation23_spill] sm:$0xff] %v2122_v43  ;;  %v2138_v48 = vld [vmem:[#allocation10 + $0x80] sm:$0xff]  ;;  %v2140_v49 = vld [vmem:[#allocation10 + $0x88] sm:$0xff]  ;;  %v2144_v50 = vld [vmem:[#allocation10 + $0x90] sm:$0xff] }
  0x67   : > { %643 = vmatpush.msrb.mxu2 %v2022_v8  ;;  %663 = vmatpush.msrb.mxu3 %v2024_v9  ;;  %2547 = vst [vmem:[#allocation24_spill] sm:$0xff] %v2126_v44  ;;  %v2146_v51 = vld [vmem:[#allocation10 + $0x98] sm:$0xff]  ;;  %v2155_v53 = vld [vmem:[#allocation10 + $0x60] sm:$0xff]  ;;  %v2157_v54 = vld [vmem:[#allocation10 + $0x68] sm:$0xff] }
  0x68   : > { %604 = vmatpush.msrb.mxu0 %v2028_v10  ;;  %624 = vmatpush.msrb.mxu1 %v2030_v11  ;;  %2548 = vst [vmem:[#allocation25_spill] sm:$0xff] %v2128_v45  ;;  %v325_v52 = vld [vmem:[%s1990_s24 + $0x18] sm:$0xff]  ;;  %v2159_v55 = vld [vmem:[#allocation10 + $0x70] sm:$0xff]  ;;  %v2163_v57 = vld [vmem:[#allocation10 + $0x40] sm:$0xff]  ;;  %s1754_s24 = scalar_lea.hbm %s2499_s4, 64 }
  0x69   : > { %644 = vmatpush.msrb.mxu2 %v2034_v12  ;;  %664 = vmatpush.msrb.mxu3 %v2036_v13  ;;  %2549 = vst [vmem:[#allocation26_spill] sm:$0xff] %v2132_v46  ;;  %v2161_v56 = vld [vmem:[#allocation10 + $0x78] sm:$0xff]  ;;  %v2165_v58 = vld [vmem:[#allocation10 + $0x48] sm:$0xff]  ;;  %v2169_v59 = vld [vmem:[#allocation10 + $0x50] sm:$0xff]  ;;  %p1756_p0 = scmp.lt.s32.totalorder %s1754_s24, %s1750_s12 }
  0x6a   : > { %605 = vmatpush.msrb.mxu0 %v2040_v14  ;;  %625 = vmatpush.msrb.mxu1 %v2042_v15  ;;  %2550 = vst [vmem:[#allocation27_spill] sm:$0xff] %v2134_v47  ;;  %v2171_v60 = vld [vmem:[#allocation10 + $0x58] sm:$0xff]  ;;  %v2175_v61 = vld [vmem:[#allocation10 + $0x20] sm:$0xff]  ;;  %v2177_v62 = vld [vmem:[#allocation10 + $0x28] sm:$0xff] }
  0x6b   : > { %645 = vmatpush.msrb.mxu2 %v2046_v16  ;;  %665 = vmatpush.msrb.mxu3 %v2048_v17  ;;  %2551 = vst [vmem:[#allocation28_spill] sm:$0xff] %v2138_v48  ;;  %v2181_v63 = vld [vmem:[#allocation10 + $0x30] sm:$0xff]  ;;  %v2183_v0 = vld [vmem:[#allocation10 + $0x38] sm:$0xff]  ;;  %v2187_v1 = vld [vmem:[#allocation10] sm:$0xff]  ;;  %p1757_p3 = por %p1756_p0, %p1755_p13 }
  0x6c   : > { %419 = vmatmul.f32.gmra.mxu0 %v323_v18  ;;  %448 = vmatmul.f32.gmra.mxu1 %v323_v18  ;;  %2552 = vst [vmem:[#allocation29_spill] sm:$0xff] %v2140_v49 }
  0x6d   : > { %477 = vmatmul.f32.gmra.mxu2 %v323_v18  ;;  %506 = vmatmul.f32.gmra.mxu3 %v323_v18  ;;  %2553 = vst [vmem:[#allocation30_spill] sm:$0xff] %v2144_v50  ;;  %v2189_v18 = vld [vmem:[#allocation10 + $0x8] sm:$0xff]  ;;  %p1758_p7 = pnand %p1757_p3, %p1753_p12 }
  0x6e   : > { %606 = vmatpush.msrb.mxu0 %v2057_v19  ;;  %626 = vmatpush.msrb.mxu1 %v2059_v20  ;;  %2554 = vst [vmem:[#allocation31_spill] sm:$0xff] %v2146_v51 }
  0x6f   : > { %646 = vmatpush.msrb.mxu2 %v2061_v21  ;;  %666 = vmatpush.msrb.mxu3 %v2063_v22  ;;  %2555 = vst [vmem:[#allocation32_spill] sm:$0xff] %v2155_v53 }
  0x70   : > { %607 = vmatpush.msrb.mxu0 %v2065_v23  ;;  %627 = vmatpush.msrb.mxu1 %v2067_v24  ;;  %2556 = vst [vmem:[#allocation33_spill] sm:$0xff] %v2157_v54 }
  0x71   : > { %647 = vmatpush.msrb.mxu2 %v2071_v25  ;;  %667 = vmatpush.msrb.mxu3 %v2073_v26  ;;  %2557 = vst [vmem:[#allocation34_spill] sm:$0xff] %v2159_v55 }
  0x72   : > { %608 = vmatpush.msrb.mxu0 %v2077_v27  ;;  %628 = vmatpush.msrb.mxu1 %v2079_v28  ;;  %2558 = vst [vmem:[#allocation35_spill] sm:$0xff] %v2161_v56 }
  0x73   : > { %648 = vmatpush.msrb.mxu2 %v2083_v29  ;;  %668 = vmatpush.msrb.mxu3 %v2085_v30  ;;  %2559 = vst [vmem:[#allocation36_spill] sm:$0xff] %v2163_v57 }
  0x74   : > { %609 = vmatpush.msrb.mxu0 %v2089_v31  ;;  %629 = vmatpush.msrb.mxu1 %v2091_v32  ;;  %2560 = vst [vmem:[#allocation37_spill] sm:$0xff] %v2165_v58 }
  0x75   : > { %649 = vmatpush.msrb.mxu2 %v2095_v33  ;;  %669 = vmatpush.msrb.mxu3 %v2097_v34  ;;  %2561 = vst [vmem:[#allocation38_spill] sm:$0xff] %v2169_v59 }
  0x76   : > { %422 = vmatmul.f32.gmra.mxu0 %v324_v35  ;;  %451 = vmatmul.f32.gmra.mxu1 %v324_v35  ;;  %2562 = vst [vmem:[#allocation39_spill] sm:$0xff] %v2171_v60 }
  0x77   : > { %480 = vmatmul.f32.gmra.mxu2 %v324_v35  ;;  %509 = vmatmul.f32.gmra.mxu3 %v324_v35  ;;  %2563 = vst [vmem:[#allocation40_spill] sm:$0xff] %v2175_v61  ;;  %v2193_v35 = vld [vmem:[#allocation10 + $0x10] sm:$0xff] }
  0x78   : > { %610 = vmatpush.msrb.mxu0 %v2106_v36  ;;  %630 = vmatpush.msrb.mxu1 %v2108_v37  ;;  %2564 = vst [vmem:[#allocation41_spill] sm:$0xff] %v2177_v62 }
  0x79   : > { %650 = vmatpush.msrb.mxu2 %v2110_v38  ;;  %670 = vmatpush.msrb.mxu3 %v2112_v39  ;;  %2565 = vst [vmem:[#allocation42_spill] sm:$0xff] %v2181_v63 }
  0x7a   : > { %611 = vmatpush.msrb.mxu0 %v2114_v40  ;;  %631 = vmatpush.msrb.mxu1 %v2116_v41  ;;  %2566 = vst [vmem:[#allocation43_spill] sm:$0xff] %v2183_v0 }
  0x7b   : > { %651 = vmatpush.msrb.mxu2 %v2120_v42  ;;  %671 = vmatpush.msrb.mxu3 %v2122_v43  ;;  %2567 = vst [vmem:[#allocation44_spill] sm:$0xff] %v2187_v1 }
  0x7c   : > { %612 = vmatpush.msrb.mxu0 %v2126_v44  ;;  %632 = vmatpush.msrb.mxu1 %v2128_v45  ;;  %2568 = vst [vmem:[#allocation45_spill] sm:$0xff] %v2189_v18 }
  0x7d   : > { %652 = vmatpush.msrb.mxu2 %v2132_v46  ;;  %672 = vmatpush.msrb.mxu3 %v2134_v47  ;;  %2569 = vst [vmem:[#allocation46_spill] sm:$0xff] %v2193_v35 }
  0x7e   : > { %613 = vmatpush.msrb.mxu0 %v2138_v48  ;;  %633 = vmatpush.msrb.mxu1 %v2140_v49 }
  0x7f   : > { %653 = vmatpush.msrb.mxu2 %v2144_v50  ;;  %673 = vmatpush.msrb.mxu3 %v2146_v51 }
  0x80   : > { %425 = vmatmul.f32.gmra.mxu0 %v325_v52  ;;  %454 = vmatmul.f32.gmra.mxu1 %v325_v52 }
  0x81   : > { %483 = vmatmul.f32.gmra.mxu2 %v325_v52  ;;  %512 = vmatmul.f32.gmra.mxu3 %v325_v52  ;;  %v2195_v52 = vld [vmem:[#allocation10 + $0x18] sm:$0xff] }
  0x82   : > { %614 = vmatpush.msrb.mxu0 %v2155_v53  ;;  %634 = vmatpush.msrb.mxu1 %v2157_v54  ;;  %2570 = vst [vmem:[#allocation47_spill] sm:$0xff] %v2195_v52 }
  0x83   : > { %654 = vmatpush.msrb.mxu2 %v2159_v55  ;;  %674 = vmatpush.msrb.mxu3 %v2161_v56 }
  0x84   : > { %615 = vmatpush.msrb.mxu0 %v2163_v57  ;;  %635 = vmatpush.msrb.mxu1 %v2165_v58  ;;  %v596_v58 = vld [vmem:[#allocation3] sm:$0xff] }
  0x85   : > { %655 = vmatpush.msrb.mxu2 %v2169_v59  ;;  %675 = vmatpush.msrb.mxu3 %v2171_v60 }
  0x86   : > { %616 = vmatpush.msrb.mxu0 %v2175_v61  ;;  %636 = vmatpush.msrb.mxu1 %v2177_v62 }
  0x87   : > { %656 = vmatpush.msrb.mxu2 %v2181_v63  ;;  %676 = vmatpush.msrb.mxu3 %v2183_v0 }
  0x88   : > { %617 = vmatpush.msrb.mxu0 %v2187_v1  ;;  %637 = vmatpush.msrb.mxu1 %v2189_v18 }
  0x89   : > { %657 = vmatpush.msrb.mxu2 %v2193_v35  ;;  %677 = vmatpush.msrb.mxu3 %v2195_v52 }
  0x8a   : > { %618 = vmatmul.f32.vlgmr.msrb.gmra.mxu0 %v596_v58  ;;  %638 = vmatmul.f32.vlgmr.msrb.gmra.mxu1 %v596_v58 }
  0x8b   : > { %658 = vmatmul.f32.vlgmr.msrb.gmra.mxu2 %v596_v58  ;;  %678 = vmatmul.f32.vlgmr.msrb.gmra.mxu3 %v596_v58  ;;  %v2571_v58 = vld [vmem:[#allocation37_spill] sm:$0xff] }
  0x8c   : > { %755 = vmatpush.msra.mxu0 %v2008_v2  ;;  %775 = vmatpush.msra.mxu1 %v2010_v3 }
  0x8d   : > { %795 = vmatpush.msra.mxu2 %v2012_v4  ;;  %815 = vmatpush.msra.mxu3 %v2014_v5 }
  0x8e   : > { %756 = vmatpush.msra.mxu0 %v2016_v6  ;;  %776 = vmatpush.msra.mxu1 %v2018_v7 }
  0x8f   : > { %796 = vmatpush.msra.mxu2 %v2022_v8  ;;  %816 = vmatpush.msra.mxu3 %v2024_v9 }
  0x90   : > { %757 = vmatpush.msra.mxu0 %v2028_v10  ;;  %777 = vmatpush.msra.mxu1 %v2030_v11 }
  0x91   : > { %797 = vmatpush.msra.mxu2 %v2034_v12  ;;  %817 = vmatpush.msra.mxu3 %v2036_v13 }
  0x92   : > { %758 = vmatpush.msra.mxu0 %v2040_v14  ;;  %778 = vmatpush.msra.mxu1 %v2042_v15 }
  0x93   : > { %798 = vmatpush.msra.mxu2 %v2046_v16  ;;  %818 = vmatpush.msra.mxu3 %v2048_v17 }
  0x94   : > { %759 = vmatpush.msra.mxu0 %v2057_v19  ;;  %779 = vmatpush.msra.mxu1 %v2059_v20 }
  0x95   : > { %799 = vmatpush.msra.mxu2 %v2061_v21  ;;  %819 = vmatpush.msra.mxu3 %v2063_v22 }
  0x96   : > { %760 = vmatpush.msra.mxu0 %v2065_v23  ;;  %780 = vmatpush.msra.mxu1 %v2067_v24 }
  0x97   : > { %800 = vmatpush.msra.mxu2 %v2071_v25  ;;  %820 = vmatpush.msra.mxu3 %v2073_v26 }
  0x98   : > { %761 = vmatpush.msra.mxu0 %v2077_v27  ;;  %781 = vmatpush.msra.mxu1 %v2079_v28 }
  0x99   : > { %801 = vmatpush.msra.mxu2 %v2083_v29  ;;  %821 = vmatpush.msra.mxu3 %v2085_v30 }
  0x9a   : > { %762 = vmatpush.msra.mxu0 %v2089_v31  ;;  %782 = vmatpush.msra.mxu1 %v2091_v32 }
  0x9b   : > { %802 = vmatpush.msra.mxu2 %v2095_v33  ;;  %822 = vmatpush.msra.mxu3 %v2097_v34 }
  0x9c   : > { %763 = vmatpush.msra.mxu0 %v2106_v36  ;;  %783 = vmatpush.msra.mxu1 %v2108_v37 }
  0x9d   : > { %803 = vmatpush.msra.mxu2 %v2110_v38  ;;  %823 = vmatpush.msra.mxu3 %v2112_v39 }
  0x9e   : > { %764 = vmatpush.msra.mxu0 %v2114_v40  ;;  %784 = vmatpush.msra.mxu1 %v2116_v41 }
  0x9f   : > { %804 = vmatpush.msra.mxu2 %v2120_v42  ;;  %824 = vmatpush.msra.mxu3 %v2122_v43 }
  0xa0   : > { %765 = vmatpush.msra.mxu0 %v2126_v44  ;;  %785 = vmatpush.msra.mxu1 %v2128_v45 }
  0xa1   : > { %805 = vmatpush.msra.mxu2 %v2132_v46  ;;  %825 = vmatpush.msra.mxu3 %v2134_v47 }
  0xa2   : > { %766 = vmatpush.msra.mxu0 %v2138_v48  ;;  %786 = vmatpush.msra.mxu1 %v2140_v49 }
  0xa3   : > { %806 = vmatpush.msra.mxu2 %v2144_v50  ;;  %826 = vmatpush.msra.mxu3 %v2146_v51 }
  0xa4   : > { %767 = vmatpush.msra.mxu0 %v2155_v53  ;;  %787 = vmatpush.msra.mxu1 %v2157_v54 }
  0xa5   : > { %807 = vmatpush.msra.mxu2 %v2159_v55  ;;  %827 = vmatpush.msra.mxu3 %v2161_v56 }
  0xa6   : > { %768 = vmatpush.msra.mxu0 %v2163_v57  ;;  %788 = vmatpush.msra.mxu1 %v2571_v58 }
  0xa7   : > { %808 = vmatpush.msra.mxu2 %v2169_v59  ;;  %828 = vmatpush.msra.mxu3 %v2171_v60 }
  0xa8   : > { %769 = vmatpush.msra.mxu0 %v2175_v61  ;;  %789 = vmatpush.msra.mxu1 %v2177_v62 }
  0xa9   : > { %809 = vmatpush.msra.mxu2 %v2181_v63  ;;  %829 = vmatpush.msra.mxu3 %v2183_v0 }
  0xaa   : > { %770 = vmatpush.msra.mxu0 %v2187_v1  ;;  %790 = vmatpush.msra.mxu1 %v2189_v18 }
  0xab   : > { %810 = vmatpush.msra.mxu2 %v2193_v35  ;;  %830 = vmatpush.msra.mxu3 %v2195_v52 }
  0xac   : > { %909 = vmatpush.msrb.mxu0 %v2008_v2  ;;  %929 = vmatpush.msrb.mxu1 %v2010_v3 }
  0xad   : > { %949 = vmatpush.msrb.mxu2 %v2012_v4  ;;  %969 = vmatpush.msrb.mxu3 %v2014_v5 }
  0xae   : > { %910 = vmatpush.msrb.mxu0 %v2016_v6  ;;  %930 = vmatpush.msrb.mxu1 %v2018_v7 }
  0xaf   : > { %950 = vmatpush.msrb.mxu2 %v2022_v8  ;;  %970 = vmatpush.msrb.mxu3 %v2024_v9 }
  0xb0   : > { %911 = vmatpush.msrb.mxu0 %v2028_v10  ;;  %931 = vmatpush.msrb.mxu1 %v2030_v11 }
  0xb1   : > { %951 = vmatpush.msrb.mxu2 %v2034_v12  ;;  %971 = vmatpush.msrb.mxu3 %v2036_v13 }
  0xb2   : > { %912 = vmatpush.msrb.mxu0 %v2040_v14  ;;  %932 = vmatpush.msrb.mxu1 %v2042_v15 }
  0xb3   : > { %952 = vmatpush.msrb.mxu2 %v2046_v16  ;;  %972 = vmatpush.msrb.mxu3 %v2048_v17 }
  0xb4   : > { %913 = vmatpush.msrb.mxu0 %v2057_v19  ;;  %933 = vmatpush.msrb.mxu1 %v2059_v20 }
  0xb5   : > { %953 = vmatpush.msrb.mxu2 %v2061_v21  ;;  %973 = vmatpush.msrb.mxu3 %v2063_v22 }
  0xb6   : > { %914 = vmatpush.msrb.mxu0 %v2065_v23  ;;  %934 = vmatpush.msrb.mxu1 %v2067_v24 }
  0xb7   : > { %954 = vmatpush.msrb.mxu2 %v2071_v25  ;;  %974 = vmatpush.msrb.mxu3 %v2073_v26 }
  0xb8   : > { %915 = vmatpush.msrb.mxu0 %v2077_v27  ;;  %935 = vmatpush.msrb.mxu1 %v2079_v28 }
  0xb9   : > { %955 = vmatpush.msrb.mxu2 %v2083_v29  ;;  %975 = vmatpush.msrb.mxu3 %v2085_v30 }
  0xba   : > { %916 = vmatpush.msrb.mxu0 %v2089_v31  ;;  %936 = vmatpush.msrb.mxu1 %v2091_v32 }
  0xbb   : > { %956 = vmatpush.msrb.mxu2 %v2095_v33  ;;  %976 = vmatpush.msrb.mxu3 %v2097_v34 }
  0xbc   : > { %917 = vmatpush.msrb.mxu0 %v2106_v36  ;;  %937 = vmatpush.msrb.mxu1 %v2108_v37 }
  0xbd   : > { %957 = vmatpush.msrb.mxu2 %v2110_v38  ;;  %977 = vmatpush.msrb.mxu3 %v2112_v39 }
  0xbe   : > { %918 = vmatpush.msrb.mxu0 %v2114_v40  ;;  %938 = vmatpush.msrb.mxu1 %v2116_v41 }
  0xbf   : > { %958 = vmatpush.msrb.mxu2 %v2120_v42  ;;  %978 = vmatpush.msrb.mxu3 %v2122_v43 }
  0xc0   : > { %919 = vmatpush.msrb.mxu0 %v2126_v44  ;;  %939 = vmatpush.msrb.mxu1 %v2128_v45 }
  0xc1   : > { %959 = vmatpush.msrb.mxu2 %v2132_v46  ;;  %979 = vmatpush.msrb.mxu3 %v2134_v47 }
  0xc2   : > { %920 = vmatpush.msrb.mxu0 %v2138_v48  ;;  %940 = vmatpush.msrb.mxu1 %v2140_v49 }
  0xc3   : > { %960 = vmatpush.msrb.mxu2 %v2144_v50  ;;  %980 = vmatpush.msrb.mxu3 %v2146_v51 }
  0xc4   : > { %921 = vmatpush.msrb.mxu0 %v2155_v53  ;;  %941 = vmatpush.msrb.mxu1 %v2157_v54 }
  0xc5   : > { %961 = vmatpush.msrb.mxu2 %v2159_v55  ;;  %981 = vmatpush.msrb.mxu3 %v2161_v56 }
  0xc6   : > { %922 = vmatpush.msrb.mxu0 %v2163_v57  ;;  %942 = vmatpush.msrb.mxu1 %v2571_v58  ;;  %v390_v57 = vld [vmem:[#allocation11] sm:$0xf] }
  0xc7   : > { %962 = vmatpush.msrb.mxu2 %v2169_v59  ;;  %982 = vmatpush.msrb.mxu3 %v2171_v60  ;;  %v393_v55 = vperm.slane %v390_v57, 1  ;;  %v395_v53 = vperm.slane %v390_v57, 3 }
  0xc8   : > { %923 = vmatpush.msrb.mxu0 %v2175_v61  ;;  %943 = vmatpush.msrb.mxu1 %v2177_v62  ;;  %v392_v61 = vperm.slane %v390_v57, 0 }
  0xc9   : > { %963 = vmatpush.msrb.mxu2 %v2181_v63  ;;  %983 = vmatpush.msrb.mxu3 %v2183_v0 }
  0xca   : > { %924 = vmatpush.msrb.mxu0 %v2187_v1  ;;  %944 = vmatpush.msrb.mxu1 %v2189_v18  ;;  %v394_v1 = vperm.slane %v390_v57, 2 }
  0xcb   : > { %964 = vmatpush.msrb.mxu2 %v2193_v35  ;;  %984 = vmatpush.msrb.mxu3 %v2195_v52 }
  0xdf   : > { %v417_v58 = vpop.f32.mrf.mxu0  ;;  %v446_v59 = vpop.f32.mrf.mxu1 }
  0xe6   : > { %v475_v60 = vpop.f32.mrf.mxu2  ;;  %v504_v56 = vpop.f32.mrf.mxu3 }
  0xe7   : > { %v476_v43 = vadd.f32 %v475_v60, %v394_v1 }
  0xe9   : > { %v420_v62 = vpop.f32.mrf.mxu0  ;;  %v449_v54 = vpop.f32.mrf.mxu1 }
  0xea   : > { %v2331_v63 = vadd.f32 %v420_v62, %v392_v61  ;;  %v2333_v0 = vadd.f32 %v449_v54, %v393_v55 }
  0xec   : > { %2572 = vst [vmem:[#allocation48_spill] sm:$0xff] %v2331_v63 }
  0xed   : > { %2573 = vst [vmem:[#allocation49_spill] sm:$0xff] %v2333_v0 }
  0xf0   : > { %v478_v18 = vpop.f32.mrf.mxu2  ;;  %v507_v51 = vpop.f32.mrf.mxu3 }
  0xf1   : > { %v2335_v35 = vadd.f32 %v478_v18, %v394_v1  ;;  %v2337_v52 = vadd.f32 %v507_v51, %v395_v53 }
  0xf3   : > { %2574 = vst [vmem:[#allocation50_spill] sm:$0xff] %v2335_v35  ;;  %v423_v50 = vpop.f32.mrf.mxu0  ;;  %v452_v49 = vpop.f32.mrf.mxu1 }
  0xf4   : > { %2575 = vst [vmem:[#allocation51_spill] sm:$0xff] %v2337_v52  ;;  %v2339_v48 = vadd.f32 %v423_v50, %v392_v61  ;;  %v2341_v47 = vadd.f32 %v452_v49, %v393_v55  ;;  %v418_v49 = vadd.f32 %v417_v58, %v392_v61 }
  0xf6   : > { %2576 = vst [vmem:[#allocation52_spill] sm:$0xff] %v2339_v48 }
  0xf7   : > { %2577 = vst [vmem:[#allocation53_spill] sm:$0xff] %v2341_v47  ;;  %v447_v47 = vadd.f32 %v446_v59, %v393_v55 }
  0xfa   : > { %v481_v46 = vpop.f32.mrf.mxu2  ;;  %v510_v45 = vpop.f32.mrf.mxu3 }
  0xfb   : > { %v2343_v62 = vadd.f32 %v481_v46, %v394_v1  ;;  %v2345_v54 = vadd.f32 %v510_v45, %v395_v53 }
  0xfd   : > { %2578 = vst [vmem:[#allocation54_spill] sm:$0xff] %v2343_v62  ;;  %v426_v0 = vpop.f32.mrf.mxu0  ;;  %v455_v57 = vpop.f32.mrf.mxu1 }
  0xfe   : > { %2579 = vst [vmem:[#allocation55_spill] sm:$0xff] %v2345_v54  ;;  %v2347_v63 = vadd.f32 %v426_v0, %v392_v61  ;;  %v2349_v18 = vadd.f32 %v455_v57, %v393_v55  ;;  %v505_v61 = vadd.f32 %v504_v56, %v395_v53 }
 0x100   : > { %2580 = vst [vmem:[#allocation56_spill] sm:$0xff] %v2347_v63 }
 0x101   : > { %2581 = vst [vmem:[#allocation57_spill] sm:$0xff] %v2349_v18 }
 0x104   : > { %v484_v51 = vpop.f32.mrf.mxu2  ;;  %v513_v52 = vpop.f32.mrf.mxu3 }
 0x105   : > { %v2351_v35 = vadd.f32 %v484_v51, %v394_v1  ;;  %v2353_v50 = vadd.f32 %v513_v52, %v395_v53 }
 0x107   : > { %2582 = vst [vmem:[#allocation58_spill] sm:$0xff] %v2351_v35  ;;  %v619_v48 = vpop.f32.mrf.mxu0  ;;  %v639_v44 = vpop.f32.mrf.mxu1 }
 0x108   : > { %2583 = vst [vmem:[#allocation59_spill] sm:$0xff] %v2353_v50  ;;  %v682_v46 = vadd.f32 %v619_v48, %v418_v49  ;;  %v683_v62 = vadd.f32 %v639_v44, %v447_v47 }
 0x10a   : > { %v1391_v45 = vmul.f32 -1.442695, %v682_v46  ;;  %v1392_v54 = vmul.f32 -1.442695, %v683_v62 }
 0x10c   : > { %1522 = vpow2.f32 %v1391_v45 }
 0x10d   : > { %1524 = vpow2.f32 %v1392_v54 }
 0x10e   : > { %v659_v0 = vpop.f32.mrf.mxu2  ;;  %v679_v55 = vpop.f32.mrf.mxu3 }
 0x10f   : > { %v684_v57 = vadd.f32 %v659_v0, %v476_v43  ;;  %v685_v47 = vadd.f32 %v679_v55, %v505_v61 }
 0x111   : > { %v1393_v18 = vmul.f32 -1.442695, %v684_v57 }
 0x112   : > { %v1523_v63 = vpop.eup %1522 }
 0x113   : > { %v1525_v42 = vpop.eup %1524  ;;  %v695_v51 = vadd.f32 1.0, %v1523_v63  ;;  %1526 = vpow2.f32 %v1393_v18 }
 0x114   : > { %v696_v52 = vadd.f32 1.0, %v1525_v42 }
 0x115   : > { %1528 = vrcp.f32 %v695_v51  ;;  %v709_v54 = vand.u32 2147483648, %v695_v51  ;;  %v707_v42 = vand.u32 2147483647, %v695_v51  ;;  %vm703_vm2 = vweird.f32 %v695_v51 }
 0x116   : > { %1530 = vrcp.f32 %v696_v52  ;;  %v724_v49 = vand.u32 2147483648, %v696_v52  ;;  %v722_v46 = vand.u32 2147483647, %v696_v52  ;;  %vm718_vm3 = vweird.f32 %v696_v52 }
 0x117   : > { %v710_v0 = vor.u32 1.1754944e-38, %v709_v54  ;;  %vm708_vm6 = vcmp.eq.f32.partialorder %v707_v42, 8.507059e+37 }
 0x118   : > { %v725_v55 = vor.u32 1.1754944e-38, %v724_v49  ;;  %vm723_vm7 = vcmp.eq.f32.partialorder %v722_v46, 8.507059e+37 }
 0x119   : > { %v1527_v59 = vpop.eup %1526 }
 0x11a   : > { %v697_v48 = vadd.f32 1.0, %v1527_v59  ;;  %v597_v59 = vld [vmem:[#allocation4] sm:$0xff] }
 0x11b   : > { %v1529_v44 = vpop.eup %1528 }
 0x11c   : > { %v1531_v58 = vpop.eup %1530  ;;  %v699_v62 = vmul.f32 %v1529_v44, %v695_v51  ;;  %1532 = vrcp.f32 %v697_v48  ;;  %vm704_vm0 = vweird.f32 %v1529_v44  ;;  %v739_v54 = vand.u32 2147483648, %v697_v48 }
 0x11d   : > { %v714_v60 = vmul.f32 %v1531_v58, %v696_v52  ;;  %1534 = vtanh.f32 %v685_v47  ;;  %vm719_vm1 = vweird.f32 %v1531_v58  ;;  %vm705_vm4 = vmor %vm703_vm2, %vm704_vm0  ;;  %vm733_vm9 = vweird.f32 %v697_v48 }
 0x11e   : > { %v700_v1 = vsub.f32 1.0, %v699_v62  ;;  %vm720_vm5 = vmor %vm718_vm3, %vm719_vm1  ;;  %v740_v42 = vor.u32 1.1754944e-38, %v739_v54 }
 0x11f   : > { %v715_v43 = vsub.f32 1.0, %v714_v60 }
 0x120   : > { %v701_v63 = vmul.f32 %v1529_v44, %v700_v1 }
 0x121   : > { %v716_v18 = vmul.f32 %v1531_v58, %v715_v43 }
 0x122   : > { %v1533_v45 = vpop.eup %1532  ;;  %v702_v53 = vadd.f32 %v1529_v44, %v701_v63 }
 0x123   : > { %v729_v56 = vmul.f32 %v1533_v45, %v697_v48  ;;  %v717_v57 = vadd.f32 %v1531_v58, %v716_v18  ;;  %v1535_v47 = vpop.eup %1534  ;;  %vm734_vm8 = vweird.f32 %v1533_v45 }
 0x124   : > { %v706_v61 = vsel %vm705_vm4, %v1529_v44, %v702_v53  ;;  %v737_v44 = vand.u32 2147483647, %v697_v48  ;;  %vm735_vm10 = vmor %vm733_vm9, %vm734_vm8 }
 0x125   : > { %v730_v62 = vsub.f32 1.0, %v729_v56  ;;  %v711_v60 = vsel %vm708_vm6, %v710_v0, %v706_v61  ;;  %v721_v1 = vsel %vm720_vm5, %v1531_v58, %v717_v57 }
 0x126   : > { %v726_v43 = vsel %vm723_vm7, %v725_v55, %v721_v1  ;;  %v745_v50 = vmul.f32 %v1535_v47, %v711_v60  ;;  %vm738_vm11 = vcmp.eq.f32.partialorder %v737_v44, 8.507059e+37  ;;  %v2613_v55 = vld [vmem:[#allocation51_spill] sm:$0xff] }
 0x127   : > { %v731_v35 = vmul.f32 %v1533_v45, %v730_v62  ;;  %v744_v63 = vmul.f32 %v726_v43, %v597_v59 }
 0x129   : > { %v2355_v51 = vadd.f32 %v745_v50, %v744_v63  ;;  %v732_v52 = vadd.f32 %v1533_v45, %v731_v35 }
 0x12b   : > { %1536 = vtanh.f32 %v2355_v51  ;;  %v736_v49 = vsel %vm735_vm10, %v1533_v45, %v732_v52 }
 0x12c   : > { %v741_v18 = vsel %vm738_vm11, %v740_v42, %v736_v49 }
 0x131   : > { %v1537_v58 = vpop.eup %1536 }
 0x132   : > { %v748_v46 = vmul.f32 %v1537_v58, %v741_v18 }
 0x134   : > { %771 = vmatmul.f32.vlgmr.msra.gmra.mxu0 %v748_v46  ;;  %749 = vst [vmem:[%s2004_s1] sm:$0xff] %v748_v46  ;;  %791 = vmatmul.f32.vlgmr.msra.gmra.mxu1 %v748_v46 }
 0x135   : > { %811 = vmatmul.f32.vlgmr.msra.gmra.mxu2 %v748_v46  ;;  %831 = vmatmul.f32.vlgmr.msra.gmra.mxu3 %v748_v46 }
 0x136   : > { %1063 = vmatpush.msra.mxu0 %v2008_v2  ;;  %1083 = vmatpush.msra.mxu1 %v2010_v3  ;;  %v2584_v2 = vld [vmem:[#allocation22_spill] sm:$0xff]  ;;  %v2585_v3 = vld [vmem:[#allocation23_spill] sm:$0xff] }
 0x137   : > { %1103 = vmatpush.msra.mxu2 %v2012_v4  ;;  %1123 = vmatpush.msra.mxu3 %v2014_v5  ;;  %v2586_v4 = vld [vmem:[#allocation24_spill] sm:$0xff]  ;;  %v2587_v5 = vld [vmem:[#allocation25_spill] sm:$0xff] }
 0x138   : > { %1064 = vmatpush.msra.mxu0 %v2016_v6  ;;  %1084 = vmatpush.msra.mxu1 %v2018_v7  ;;  %v2588_v6 = vld [vmem:[#allocation26_spill] sm:$0xff]  ;;  %v2589_v7 = vld [vmem:[#allocation27_spill] sm:$0xff] }
 0x139   : > { %1104 = vmatpush.msra.mxu2 %v2022_v8  ;;  %1124 = vmatpush.msra.mxu3 %v2024_v9  ;;  %v2590_v8 = vld [vmem:[#allocation28_spill] sm:$0xff]  ;;  %v2591_v9 = vld [vmem:[#allocation29_spill] sm:$0xff] }
 0x13a   : > { %1065 = vmatpush.msra.mxu0 %v2028_v10  ;;  %1085 = vmatpush.msra.mxu1 %v2030_v11  ;;  %v2592_v10 = vld [vmem:[#allocation30_spill] sm:$0xff]  ;;  %v2593_v11 = vld [vmem:[#allocation31_spill] sm:$0xff] }
 0x13b   : > { %1105 = vmatpush.msra.mxu2 %v2034_v12  ;;  %1125 = vmatpush.msra.mxu3 %v2036_v13  ;;  %v2594_v12 = vld [vmem:[#allocation32_spill] sm:$0xff]  ;;  %v2595_v13 = vld [vmem:[#allocation33_spill] sm:$0xff] }
 0x13c   : > { %1066 = vmatpush.msra.mxu0 %v2040_v14  ;;  %1086 = vmatpush.msra.mxu1 %v2042_v15  ;;  %v2596_v14 = vld [vmem:[#allocation34_spill] sm:$0xff]  ;;  %v2597_v15 = vld [vmem:[#allocation35_spill] sm:$0xff] }
 0x13d   : > { %1106 = vmatpush.msra.mxu2 %v2046_v16  ;;  %1126 = vmatpush.msra.mxu3 %v2048_v17  ;;  %v2598_v16 = vld [vmem:[#allocation36_spill] sm:$0xff]  ;;  %v2599_v17 = vld [vmem:[#allocation37_spill] sm:$0xff] }
 0x13e   : > { %1067 = vmatpush.msra.mxu0 %v2057_v19  ;;  %1087 = vmatpush.msra.mxu1 %v2059_v20  ;;  %v2600_v19 = vld [vmem:[#allocation38_spill] sm:$0xff]  ;;  %v2601_v20 = vld [vmem:[#allocation39_spill] sm:$0xff] }
 0x13f   : > { %1107 = vmatpush.msra.mxu2 %v2061_v21  ;;  %1127 = vmatpush.msra.mxu3 %v2063_v22  ;;  %v2602_v21 = vld [vmem:[#allocation40_spill] sm:$0xff]  ;;  %v2603_v22 = vld [vmem:[#allocation41_spill] sm:$0xff] }
 0x140   : > { %1068 = vmatpush.msra.mxu0 %v2065_v23  ;;  %1088 = vmatpush.msra.mxu1 %v2067_v24  ;;  %v2604_v23 = vld [vmem:[#allocation42_spill] sm:$0xff]  ;;  %v2605_v24 = vld [vmem:[#allocation43_spill] sm:$0xff] }
 0x141   : > { %1108 = vmatpush.msra.mxu2 %v2071_v25  ;;  %1128 = vmatpush.msra.mxu3 %v2073_v26  ;;  %v2606_v25 = vld [vmem:[#allocation44_spill] sm:$0xff]  ;;  %v2607_v26 = vld [vmem:[#allocation45_spill] sm:$0xff] }
 0x142   : > { %1069 = vmatpush.msra.mxu0 %v2077_v27  ;;  %1089 = vmatpush.msra.mxu1 %v2079_v28  ;;  %v2608_v27 = vld [vmem:[#allocation46_spill] sm:$0xff]  ;;  %v2609_v28 = vld [vmem:[#allocation47_spill] sm:$0xff] }
 0x143   : > { %1109 = vmatpush.msra.mxu2 %v2083_v29  ;;  %1129 = vmatpush.msra.mxu3 %v2085_v30 }
 0x144   : > { %1070 = vmatpush.msra.mxu0 %v2089_v31  ;;  %1090 = vmatpush.msra.mxu1 %v2091_v32  ;;  %v2610_v31 = vld [vmem:[#allocation48_spill] sm:$0xff] }
 0x145   : > { %1110 = vmatpush.msra.mxu2 %v2095_v33  ;;  %1130 = vmatpush.msra.mxu3 %v2097_v34  ;;  %v2611_v33 = vld [vmem:[#allocation49_spill] sm:$0xff] }
 0x146   : > { %1071 = vmatpush.msra.mxu0 %v2106_v36  ;;  %1091 = vmatpush.msra.mxu1 %v2108_v37 }
 0x147   : > { %1111 = vmatpush.msra.mxu2 %v2110_v38  ;;  %1131 = vmatpush.msra.mxu3 %v2112_v39  ;;  %v2612_v39 = vld [vmem:[#allocation50_spill] sm:$0xff] }
 0x148   : > { %1072 = vmatpush.msra.mxu0 %v2114_v40  ;;  %1092 = vmatpush.msra.mxu1 %v2116_v41 }
 0x149   : > { %1112 = vmatpush.msra.mxu2 %v2584_v2  ;;  %1132 = vmatpush.msra.mxu3 %v2585_v3 }
 0x14a   : > { %1073 = vmatpush.msra.mxu0 %v2586_v4  ;;  %1093 = vmatpush.msra.mxu1 %v2587_v5 }
 0x14b   : > { %1113 = vmatpush.msra.mxu2 %v2588_v6  ;;  %1133 = vmatpush.msra.mxu3 %v2589_v7 }
 0x14c   : > { %1074 = vmatpush.msra.mxu0 %v2590_v8  ;;  %1094 = vmatpush.msra.mxu1 %v2591_v9 }
 0x14d   : > { %1114 = vmatpush.msra.mxu2 %v2592_v10  ;;  %1134 = vmatpush.msra.mxu3 %v2593_v11 }
 0x14e   : > { %1075 = vmatpush.msra.mxu0 %v2594_v12  ;;  %1095 = vmatpush.msra.mxu1 %v2595_v13 }
 0x14f   : > { %1115 = vmatpush.msra.mxu2 %v2596_v14  ;;  %1135 = vmatpush.msra.mxu3 %v2597_v15 }
 0x150   : > { %1076 = vmatpush.msra.mxu0 %v2598_v16  ;;  %1096 = vmatpush.msra.mxu1 %v2599_v17 }
 0x151   : > { %1116 = vmatpush.msra.mxu2 %v2600_v19  ;;  %1136 = vmatpush.msra.mxu3 %v2601_v20 }
 0x152   : > { %1077 = vmatpush.msra.mxu0 %v2602_v21  ;;  %1097 = vmatpush.msra.mxu1 %v2603_v22 }
 0x153   : > { %1117 = vmatpush.msra.mxu2 %v2604_v23  ;;  %1137 = vmatpush.msra.mxu3 %v2605_v24  ;;  %v2614_v24 = vld [vmem:[#allocation52_spill] sm:$0xff] }
 0x154   : > { %1078 = vmatpush.msra.mxu0 %v2606_v25  ;;  %1098 = vmatpush.msra.mxu1 %v2607_v26  ;;  %v2615_v26 = vld [vmem:[#allocation53_spill] sm:$0xff] }
 0x155   : > { %1118 = vmatpush.msra.mxu2 %v2608_v27  ;;  %1138 = vmatpush.msra.mxu3 %v2609_v28 }
 0x1b1   : > { %v772_v29 = vpop.f32.mrf.mxu0  ;;  %v792_v30 = vpop.f32.mrf.mxu1 }
 0x1b2   : > { %v835_v32 = vadd.f32 %v772_v29, %v2610_v31  ;;  %v836_v34 = vadd.f32 %v792_v30, %v2611_v33  ;;  %v2616_v31 = vld [vmem:[#allocation54_spill] sm:$0xff] }
 0x1b4   : > { %v1394_v36 = vmul.f32 -1.442695, %v835_v32  ;;  %v1395_v37 = vmul.f32 -1.442695, %v836_v34 }
 0x1b6   : > { %1538 = vpow2.f32 %v1394_v36 }
 0x1b7   : > { %1540 = vpow2.f32 %v1395_v37 }
 0x1b8   : > { %v812_v38 = vpop.f32.mrf.mxu2  ;;  %v832_v53 = vpop.f32.mrf.mxu3 }
 0x1b9   : > { %v837_v40 = vadd.f32 %v812_v38, %v2612_v39  ;;  %v838_v59 = vadd.f32 %v832_v53, %v2613_v55 }
 0x1bb   : > { %v1396_v41 = vmul.f32 -1.442695, %v837_v40 }
 0x1bc   : > { %v1539_v35 = vpop.eup %1538 }
 0x1bd   : > { %v1541_v50 = vpop.eup %1540  ;;  %v848_v48 = vadd.f32 1.0, %v1539_v35  ;;  %1542 = vpow2.f32 %v1396_v41 }
 0x1be   : > { %v849_v45 = vadd.f32 1.0, %v1541_v50  ;;  %v2617_v50 = vld [vmem:[#allocation55_spill] sm:$0xff] }
 0x1bf   : > { %1544 = vrcp.f32 %v848_v48  ;;  %v862_v43 = vand.u32 2147483648, %v848_v48  ;;  %v860_v54 = vand.u32 2147483647, %v848_v48  ;;  %vm856_vm14 = vweird.f32 %v848_v48 }
 0x1c0   : > { %1546 = vrcp.f32 %v849_v45  ;;  %v877_v63 = vand.u32 2147483648, %v849_v45  ;;  %v875_v49 = vand.u32 2147483647, %v849_v45  ;;  %vm871_vm15 = vweird.f32 %v849_v45 }
 0x1c1   : > { %v863_v46 = vor.u32 1.1754944e-38, %v862_v43  ;;  %vm861_vm2 = vcmp.eq.f32.partialorder %v860_v54, 8.507059e+37 }
 0x1c2   : > { %v878_v3 = vor.u32 1.1754944e-38, %v877_v63  ;;  %vm876_vm3 = vcmp.eq.f32.partialorder %v875_v49, 8.507059e+37 }
 0x1c3   : > { %v1543_v56 = vpop.eup %1542 }
 0x1c4   : > { %v850_v0 = vadd.f32 1.0, %v1543_v56 }
 0x1c5   : > { %v1545_v57 = vpop.eup %1544 }
 0x1c6   : > { %v1547_v61 = vpop.eup %1546  ;;  %v852_v47 = vmul.f32 %v1545_v57, %v848_v48  ;;  %1548 = vrcp.f32 %v850_v0  ;;  %vm857_vm12 = vweird.f32 %v1545_v57  ;;  %v892_v15 = vand.u32 2147483648, %v850_v0 }
 0x1c7   : > { %v867_v62 = vmul.f32 %v1547_v61, %v849_v45  ;;  %1550 = vtanh.f32 %v838_v59  ;;  %vm872_vm13 = vweird.f32 %v1547_v61  ;;  %vm858_vm0 = vmor %vm856_vm14, %vm857_vm12  ;;  %vm886_vm5 = vweird.f32 %v850_v0 }
 0x1c8   : > { %v853_v60 = vsub.f32 1.0, %v852_v47  ;;  %vm873_vm1 = vmor %vm871_vm15, %vm872_vm13  ;;  %v890_v16 = vand.u32 2147483647, %v850_v0  ;;  %v893_v19 = vor.u32 1.1754944e-38, %v892_v15 }
 0x1c9   : > { %v868_v1 = vsub.f32 1.0, %v867_v62 }
 0x1ca   : > { %v854_v52 = vmul.f32 %v1545_v57, %v853_v60  ;;  %vm891_vm7 = vcmp.eq.f32.partialorder %v890_v16, 8.507059e+37 }
 0x1cb   : > { %v869_v44 = vmul.f32 %v1547_v61, %v868_v1 }
 0x1cc   : > { %v1549_v42 = vpop.eup %1548  ;;  %v855_v58 = vadd.f32 %v1545_v57, %v854_v52 }
 0x1cd   : > { %v882_v18 = vmul.f32 %v1549_v42, %v850_v0  ;;  %v870_v2 = vadd.f32 %v1547_v61, %v869_v44  ;;  %v1551_v5 = vpop.eup %1550  ;;  %vm887_vm4 = vweird.f32 %v1549_v42 }
 0x1ce   : > { %v859_v4 = vsel %vm858_vm0, %v1545_v57, %v855_v58  ;;  %vm888_vm6 = vmor %vm886_vm5, %vm887_vm4 }
 0x1cf   : > { %v883_v6 = vsub.f32 1.0, %v882_v18  ;;  %v864_v7 = vsel %vm861_vm2, %v863_v46, %v859_v4  ;;  %v874_v8 = vsel %vm873_vm1, %v1547_v61, %v870_v2 }
 0x1d0   : > { %v879_v9 = vsel %vm876_vm3, %v878_v3, %v874_v8  ;;  %v898_v10 = vmul.f32 %v1551_v5, %v864_v7 }
 0x1d1   : > { %v884_v11 = vmul.f32 %v1549_v42, %v883_v6  ;;  %v897_v12 = vmul.f32 %v879_v9, %v2355_v51 }
 0x1d3   : > { %v2428_v13 = vadd.f32 %v898_v10, %v897_v12  ;;  %v885_v14 = vadd.f32 %v1549_v42, %v884_v11 }
 0x1d5   : > { %1552 = vtanh.f32 %v2428_v13  ;;  %v889_v17 = vsel %vm888_vm6, %v1549_v42, %v885_v14 }
 0x1d6   : > { %v894_v21 = vsel %vm891_vm7, %v893_v19, %v889_v17  ;;  %v2618_v17 = vld [vmem:[#allocation56_spill] sm:$0xff] }
 0x1db   : > { %v1553_v20 = vpop.eup %1552 }
 0x1dc   : > { %v901_v22 = vmul.f32 %v1553_v20, %v894_v21  ;;  %v2619_v20 = vld [vmem:[#allocation57_spill] sm:$0xff] }
 0x1de   : > { %925 = vmatmul.f32.vlgmr.msrb.gmra.mxu0 %v901_v22  ;;  %1397 = vst [vmem:[%s2004_s1 + $0x8] sm:$0xff] %v901_v22  ;;  %945 = vmatmul.f32.vlgmr.msrb.gmra.mxu1 %v901_v22 }
 0x1df   : > { %965 = vmatmul.f32.vlgmr.msrb.gmra.mxu2 %v901_v22  ;;  %985 = vmatmul.f32.vlgmr.msrb.gmra.mxu3 %v901_v22 }
 0x25b   : > { %v926_v51 = vpop.f32.mrf.mxu0  ;;  %v946_v23 = vpop.f32.mrf.mxu1 }
 0x25c   : > { %v989_v25 = vadd.f32 %v926_v51, %v2614_v24  ;;  %v990_v27 = vadd.f32 %v946_v23, %v2615_v26  ;;  %v2620_v24 = vld [vmem:[#allocation58_spill] sm:$0xff] }
 0x25e   : > { %v1398_v28 = vmul.f32 -1.442695, %v989_v25  ;;  %v1399_v29 = vmul.f32 -1.442695, %v990_v27 }
 0x260   : > { %1554 = vpow2.f32 %v1398_v28 }
 0x261   : > { %1556 = vpow2.f32 %v1399_v29 }
 0x262   : > { %v966_v30 = vpop.f32.mrf.mxu2  ;;  %v986_v39 = vpop.f32.mrf.mxu3 }
 0x263   : > { %v991_v32 = vadd.f32 %v966_v30, %v2616_v31  ;;  %v992_v48 = vadd.f32 %v986_v39, %v2617_v50 }
 0x265   : > { %v1400_v33 = vmul.f32 -1.442695, %v991_v32 }
 0x266   : > { %v1555_v34 = vpop.eup %1554 }
 0x267   : > { %v1557_v36 = vpop.eup %1556  ;;  %v1002_v37 = vadd.f32 1.0, %v1555_v34  ;;  %1558 = vpow2.f32 %v1400_v33 }
 0x268   : > { %v1003_v38 = vadd.f32 1.0, %v1557_v36  ;;  %v2621_v36 = vld [vmem:[#allocation59_spill] sm:$0xff] }
 0x269   : > { %1560 = vrcp.f32 %v1002_v37  ;;  %v1016_v55 = vand.u32 2147483648, %v1002_v37  ;;  %v1014_v47 = vand.u32 2147483647, %v1002_v37  ;;  %vm1010_vm10 = vweird.f32 %v1002_v37 }
 0x26a   : > { %1562 = vrcp.f32 %v1003_v38  ;;  %v1031_v59 = vand.u32 2147483648, %v1003_v38  ;;  %v1029_v60 = vand.u32 2147483647, %v1003_v38  ;;  %vm1025_vm11 = vweird.f32 %v1003_v38 }
 0x26b   : > { %v1017_v52 = vor.u32 1.1754944e-38, %v1016_v55  ;;  %vm1015_vm14 = vcmp.eq.f32.partialorder %v1014_v47, 8.507059e+37 }
 0x26c   : > { %v1032_v44 = vor.u32 1.1754944e-38, %v1031_v59  ;;  %vm1030_vm15 = vcmp.eq.f32.partialorder %v1029_v60, 8.507059e+37 }
 0x26d   : > { %v1559_v40 = vpop.eup %1558 }
 0x26e   : > { %v1004_v41 = vadd.f32 1.0, %v1559_v40 }
 0x26f   : > { %v1561_v35 = vpop.eup %1560 }
 0x270   : > { %v1563_v45 = vpop.eup %1562  ;;  %v1006_v53 = vmul.f32 %v1561_v35, %v1002_v37  ;;  %1564 = vrcp.f32 %v1004_v41  ;;  %vm1011_vm8 = vweird.f32 %v1561_v35  ;;  %v1046_v8 = vand.u32 2147483648, %v1004_v41 }
 0x271   : > { %v1021_v56 = vmul.f32 %v1563_v45, %v1003_v38  ;;  %1566 = vtanh.f32 %v992_v48  ;;  %vm1026_vm9 = vweird.f32 %v1563_v45  ;;  %vm1012_vm12 = vmor %vm1010_vm10, %vm1011_vm8  ;;  %vm1040_vm1 = vweird.f32 %v1004_v41 }
 0x272   : > { %v1007_v0 = vsub.f32 1.0, %v1006_v53  ;;  %vm1027_vm13 = vmor %vm1025_vm11, %vm1026_vm9  ;;  %v1044_v9 = vand.u32 2147483647, %v1004_v41  ;;  %v1047_v11 = vor.u32 1.1754944e-38, %v1046_v8 }
 0x273   : > { %v1022_v57 = vsub.f32 1.0, %v1021_v56 }
 0x274   : > { %v1008_v61 = vmul.f32 %v1561_v35, %v1007_v0  ;;  %vm1045_vm3 = vcmp.eq.f32.partialorder %v1044_v9, 8.507059e+37 }
 0x275   : > { %v1023_v62 = vmul.f32 %v1563_v45, %v1022_v57 }
 0x276   : > { %v1565_v1 = vpop.eup %1564  ;;  %v1009_v43 = vadd.f32 %v1561_v35, %v1008_v61 }
 0x277   : > { %v1036_v63 = vmul.f32 %v1565_v1, %v1004_v41  ;;  %v1024_v54 = vadd.f32 %v1563_v45, %v1023_v62  ;;  %v1567_v42 = vpop.eup %1566  ;;  %vm1041_vm0 = vweird.f32 %v1565_v1 }
 0x278   : > { %v1013_v49 = vsel %vm1012_vm12, %v1561_v35, %v1009_v43  ;;  %vm1042_vm2 = vmor %vm1040_vm1, %vm1041_vm0 }
 0x279   : > { %v1037_v58 = vsub.f32 1.0, %v1036_v63  ;;  %v1018_v18 = vsel %vm1015_vm14, %v1017_v52, %v1013_v49  ;;  %v1028_v46 = vsel %vm1027_vm13, %v1563_v45, %v1024_v54 }
 0x27a   : > { %v1033_v2 = vsel %vm1030_vm15, %v1032_v44, %v1028_v46  ;;  %v1052_v3 = vmul.f32 %v1567_v42, %v1018_v18 }
 0x27b   : > { %v1038_v4 = vmul.f32 %v1565_v1, %v1037_v58  ;;  %v1051_v5 = vmul.f32 %v1033_v2, %v2428_v13 }
 0x27d   : > { %v2437_v6 = vadd.f32 %v1052_v3, %v1051_v5  ;;  %v1039_v7 = vadd.f32 %v1565_v1, %v1038_v4 }
 0x27f   : > { %1568 = vtanh.f32 %v2437_v6  ;;  %v1043_v10 = vsel %vm1042_vm2, %v1565_v1, %v1039_v7 }
 0x280   : > { %v1048_v14 = vsel %vm1045_vm3, %v1047_v11, %v1043_v10 }
 0x285   : > { %v1569_v12 = vpop.eup %1568 }
 0x286   : > { %v1055_v15 = vmul.f32 %v1569_v12, %v1048_v14 }
 0x288   : > { %1079 = vmatmul.f32.vlgmr.msra.gmra.mxu0 %v1055_v15  ;;  %1401 = vst [vmem:[%s2004_s1 + $0x10] sm:$0xff] %v1055_v15  ;;  %1099 = vmatmul.f32.vlgmr.msra.gmra.mxu1 %v1055_v15 }
 0x289   : > { %1119 = vmatmul.f32.vlgmr.msra.gmra.mxu2 %v1055_v15  ;;  %1139 = vmatmul.f32.vlgmr.msra.gmra.mxu3 %v1055_v15 }
 0x305   : > { %v1080_v13 = vpop.f32.mrf.mxu0  ;;  %v1100_v16 = vpop.f32.mrf.mxu1 }
 0x306   : > { %v1143_v19 = vadd.f32 %v1080_v13, %v2618_v17  ;;  %v1144_v21 = vadd.f32 %v1100_v16, %v2619_v20 }
 0x308   : > { %v1402_v22 = vmul.f32 -1.442695, %v1143_v19  ;;  %v1403_v51 = vmul.f32 -1.442695, %v1144_v21 }
 0x30a   : > { %1570 = vpow2.f32 %v1402_v22 }
 0x30b   : > { %1572 = vpow2.f32 %v1403_v51 }
 0x30c   : > { %v1120_v23 = vpop.f32.mrf.mxu2  ;;  %v1140_v31 = vpop.f32.mrf.mxu3 }
 0x30d   : > { %v1145_v25 = vadd.f32 %v1120_v23, %v2620_v24  ;;  %v1146_v37 = vadd.f32 %v1140_v31, %v2621_v36 }
 0x30f   : > { %v1404_v26 = vmul.f32 -1.442695, %v1145_v25 }
 0x310   : > { %v1571_v27 = vpop.eup %1570 }
 0x311   : > { %v1573_v28 = vpop.eup %1572  ;;  %v1156_v29 = vadd.f32 1.0, %v1571_v27  ;;  %1574 = vpow2.f32 %v1404_v26 }
 0x312   : > { %v1157_v30 = vadd.f32 1.0, %v1573_v28 }
 0x313   : > { %1576 = vrcp.f32 %v1156_v29  ;;  %v1170_v50 = vand.u32 2147483648, %v1156_v29  ;;  %v1168_v53 = vand.u32 2147483647, %v1156_v29  ;;  %vm1164_vm6 = vweird.f32 %v1156_v29 }
 0x314   : > { %1578 = vrcp.f32 %v1157_v30  ;;  %v1185_v48 = vand.u32 2147483648, %v1157_v30  ;;  %v1183_v0 = vand.u32 2147483647, %v1157_v30  ;;  %vm1179_vm7 = vweird.f32 %v1157_v30 }
 0x315   : > { %v1171_v61 = vor.u32 1.1754944e-38, %v1170_v50  ;;  %vm1169_vm10 = vcmp.eq.f32.partialorder %v1168_v53, 8.507059e+37 }
 0x316   : > { %v1186_v62 = vor.u32 1.1754944e-38, %v1185_v48  ;;  %vm1184_vm11 = vcmp.eq.f32.partialorder %v1183_v0, 8.507059e+37 }
 0x317   : > { %v1575_v32 = vpop.eup %1574 }
 0x318   : > { %v1158_v33 = vadd.f32 1.0, %v1575_v32 }
 0x319   : > { %v1577_v34 = vpop.eup %1576 }
 0x31a   : > { %v1579_v38 = vpop.eup %1578  ;;  %v1160_v39 = vmul.f32 %v1577_v34, %v1156_v29  ;;  %1580 = vrcp.f32 %v1158_v33  ;;  %vm1165_vm4 = vweird.f32 %v1577_v34  ;;  %v1200_v46 = vand.u32 2147483648, %v1158_v33 }
 0x31b   : > { %v1175_v40 = vmul.f32 %v1579_v38, %v1157_v30  ;;  %1582 = vtanh.f32 %v1146_v37  ;;  %vm1180_vm5 = vweird.f32 %v1579_v38  ;;  %vm1166_vm8 = vmor %vm1164_vm6, %vm1165_vm4  ;;  %vm1194_vm13 = vweird.f32 %v1158_v33 }
 0x31c   : > { %v1161_v41 = vsub.f32 1.0, %v1160_v39  ;;  %vm1181_vm9 = vmor %vm1179_vm7, %vm1180_vm5  ;;  %v1198_v2 = vand.u32 2147483647, %v1158_v33  ;;  %v1201_v4 = vor.u32 1.1754944e-38, %v1200_v46 }
 0x31d   : > { %v1176_v35 = vsub.f32 1.0, %v1175_v40 }
 0x31e   : > { %v1162_v45 = vmul.f32 %v1577_v34, %v1161_v41  ;;  %vm1199_vm15 = vcmp.eq.f32.partialorder %v1198_v2, 8.507059e+37 }
 0x31f   : > { %v1177_v56 = vmul.f32 %v1579_v38, %v1176_v35 }
 0x320   : > { %v1581_v57 = vpop.eup %1580  ;;  %v1163_v55 = vadd.f32 %v1577_v34, %v1162_v45 }
 0x321   : > { %v1190_v59 = vmul.f32 %v1581_v57, %v1158_v33  ;;  %v1178_v47 = vadd.f32 %v1579_v38, %v1177_v56  ;;  %v1583_v1 = vpop.eup %1582  ;;  %vm1195_vm12 = vweird.f32 %v1581_v57 }
 0x322   : > { %v1167_v60 = vsel %vm1166_vm8, %v1577_v34, %v1163_v55  ;;  %vm1196_vm14 = vmor %vm1194_vm13, %vm1195_vm12 }
 0x323   : > { %v1191_v43 = vsub.f32 1.0, %v1190_v59  ;;  %v1172_v63 = vsel %vm1169_vm10, %v1171_v61, %v1167_v60  ;;  %v1182_v52 = vsel %vm1181_vm9, %v1579_v38, %v1178_v47 }
 0x324   : > { %v1187_v54 = vsel %vm1184_vm11, %v1186_v62, %v1182_v52  ;;  %v1206_v44 = vmul.f32 %v1583_v1, %v1172_v63 }
 0x325   : > { %v1192_v49 = vmul.f32 %v1581_v57, %v1191_v43  ;;  %v1205_v42 = vmul.f32 %v1187_v54, %v2437_v6 }
 0x327   : > { %v1207_v58 = vadd.f32 %v1206_v44, %v1205_v42  ;;  %v1193_v18 = vadd.f32 %v1581_v57, %v1192_v49 }
 0x329   : > { %1584 = vtanh.f32 %v1207_v58  ;;  %1213 = vst [vmem:[#allocation4] sm:$0xff] %v1207_v58  ;;  %v1197_v3 = vsel %vm1196_vm14, %v1581_v57, %v1193_v18 }
 0x32a   : > { %1214 = vst [vmem:[#allocation14] sm:$0xff] %v1207_v58  ;;  %v1202_v6 = vsel %vm1199_vm15, %v1201_v4, %v1197_v3 }
 0x32b   : > { %1431 = dma.vmem_to_hbm [thread:$0]  (%p1909_p2), %s1247_s3, 128, %s1249_s8, [#allocation15]  }
 0x32f   : > { %v1585_v5 = vpop.eup %1584 }
 0x330   : > { %v1209_v7 = vmul.f32 %v1585_v5, %v1202_v6 }
 0x332   : > { %1212 = vst [vmem:[#allocation3] sm:$0xff] %v1209_v7 }
 0x333   : > { %1405 = vst [vmem:[%s2004_s1 + $0x18] sm:$0xff] %v1209_v7 }
 0x334   : > { %1761 = shalt.err (!%p1758_p7)
}
 0x335   : > { %s1839_s10 = smov 128   ;;  %s1840_s1 = smov 8  }
 0x336   : > { %1429 = dma.vmem_to_hbm [thread:$0]  (%p1966_p5), %s1230_s21, 512, %s1232_s30, %s1216_s6, %s1839_s10, %s1839_s10, %s1840_s1  }
 0x337   : > { %1799 = dma.done.wait (%p1909_p2), [#allocation15], 128  }
 0x338   : > { %1801 = vsyncadd (%p1909_p2), [#allocation15], 4294967168 }
 0x339 PF: > { %s1265_s26 = sand.u32 1, %s1808_s18   ;;  %p1450_p9 = pnand %p1380_p11, %p1920_p6 }
 0x33a   : > { %s1266_s28 = scalar_lea.sflag [#allocation7], %s1265_s26 }
 0x33b   : > { %p1451_p10 = pneg %p1450_p9 }
 0x33d   : > { %1803 = dma.done.wait (%p1451_p10), %s1266_s28, 512  }
 0x33e   : > { %1805 = vsyncadd (%p1451_p10), %s1266_s28, 4294966784  ;;  %s25_s23 = sadd.s32 1, %s1828_s23   ;;  %s2622_s27 = sld [smem:[#allocation21_spill]] }
 0x33f   : > { %p22_p5 = scmp.ge.s32.totalorder %s25_s23, 4   ;;  %s2623_s18 = smov %s1812_s19 }
 0x340   : > { %s2624_s19 = smov %s1816_s20  ;;  %s2625_s20 = smov %s1975_s17 }
 0x341   : > { %s2626_s21 = smov %s1824_s22  ;;  %24 = sbr.rel (!%p22_p5) target bundleno = 13 (0xd), region = 112 }
 0x344   : > { %s2627_s22 = smov %s2622_s27 }
 0x346   :  { %1272 = vsyncpa [#allocation6], 1 }
 0x347   :  { %1274 = vsyncpa [#allocation6 + $0x1], 1 }
 0x348   :  { %1275 = vsyncpa [#allocation9], 1 }
 0x349   :  { %1276 = vsyncpa [#allocation12], 1 }
 0x34a   :  { %1277 = vsyncpa [#allocation7], 1 }
 0x34b   :  { %1279 = vsyncpa [#allocation7 + $0x1], 1 }
 0x34c   :  { %1280 = vsyncpa [#allocation15], 1 }

</bundles_post_ra>
